<compile_context>
chip_gen: v7x
topology: tpu7x:2x2x1
jax: 0.10.0
libtpu: 0.0.40
codegen_flags: <defaults>
</compile_context>

<pallas_src>
import functools

import numpy as np
import jax
import jax.numpy as jnp
from jax.experimental import pallas as pl
from jax.experimental.pallas import tpu as pltpu


def _round_up(v: int, m: int) -> int:
    return ((v + m - 1) // m) * m


# --------------------------------------------------------------------------
# Host-side selection-matrix construction (pure index math, cached).
# --------------------------------------------------------------------------
def _build_selT(angles_deg, H: int, W: int, HWp: int, R_pad: int) -> np.ndarray:
    """(R_pad, HWp, HWp) transposed one-hot selection matrices.

    selT[r, src, dst] = 1 iff output pixel `dst` of rotation r samples input
    pixel `src` (nearest neighbor, zero fill, center = image center).  Rows
    r >= len(angles_deg) and flat indices >= H*W stay zero (padding).
    """
    # TODO(synk): torchvision F.rotate uses its own affine-grid center /
    # rounding convention; boundary pixels may differ by one vs torch output.
    cy, cx = (H - 1) / 2.0, (W - 1) / 2.0
    ii, jj = np.meshgrid(np.arange(H), np.arange(W), indexing="ij")
    dx = (jj - cx).reshape(-1)
    dy = (ii - cy).reshape(-1)
    out_flat = (ii * W + jj).reshape(-1)
    selT = np.zeros((R_pad, HWp, HWp), dtype=np.float32)
    for r, a in enumerate(angles_deg):
        th = np.deg2rad(float(a))
        # inverse map (output pixel -> source pixel); positive angle = CCW.
        src_x = np.cos(th) * dx - np.sin(th) * dy + cx
        src_y = np.sin(th) * dx + np.cos(th) * dy + cy
        sc = np.floor(src_x + 0.5).astype(np.int64)
        sr = np.floor(src_y + 0.5).astype(np.int64)
        valid = (sr >= 0) & (sr < H) & (sc >= 0) & (sc < W)
        src_flat = np.clip(sr, 0, H - 1) * W + np.clip(sc, 0, W - 1)
        selT[r, src_flat, out_flat] = valid.astype(np.float32)
    return selT


_SEL_CACHE = {}


def _get_selT(H: int, W: int, count: int, key, HWp: int, R_pad: int):
    """Cached (R_pad, HWp, HWp) bf16 device array of transposed selections."""
    try:
        kb = np.asarray(jax.device_get(key)).tobytes()
    except Exception:
        kb = np.asarray(jax.device_get(jax.random.key_data(key))).tobytes()
    ck = (H, W, count, kb, HWp, R_pad)
    if ck not in _SEL_CACHE:
        deg = 360.0 / count
        # Replicate the original module: range(0, 360, int(self.deg)).
        starts = np.arange(0, 360, int(deg), dtype=np.float64)
        R = len(starts)
        # TODO(synk): torch RandomRotation resamples per forward(); here the
        # angles are sampled once from `key` (uniform in [start, start + 1)).
        u = np.asarray(jax.device_get(jax.random.uniform(key, (R,))), np.float64)
        angles = starts + u
        selT = _build_selT(angles, H, W, HWp, R_pad)
        # bf16 is exact for a 0/1 mask; halves the dominant HBM stream.
        _SEL_CACHE[ck] = (jnp.asarray(selT, dtype=jnp.bfloat16), R)
    return _SEL_CACHE[ck]


# --------------------------------------------------------------------------
# Pallas kernel: B fused rotations per grid step, lane-dense (C, HWp) tiles.
# --------------------------------------------------------------------------
def _make_rotate_kernel(B: int, N: int, img_static: bool):
    def kernel(x_ref, selT_ref, o_ref):
        # x_ref:    (N, C, HWp) f32   -- fully VMEM-resident (constant index map)
        # selT_ref: (B, HWp, HWp) bf16 (or f32 fallback) one-hot selections
        # o_ref:    (B, C, HWp) f32
        g = pl.program_id(0)
        for j in range(B):                      # static unroll, B <= 16
            if img_static:                      # B % N == 0 -> Python constant
                xi = x_ref[j % N]
            else:
                xi = x_ref[(g * B + j) % N]     # rep[k] = x[k % N]
            # selT goes straight to the MXU (f32 accumulation); no per-j
            # f32 upcast temp is materialized in VMEM.
            o_ref[j] = jnp.dot(
                xi, selT_ref[j], preferred_element_type=jnp.float32
            ).astype(o_ref.dtype)

    return kernel


@functools.lru_cache(maxsize=None)
def _make_rotate_call(N, C, HWp, B, G, img_static, x_dtype_name, vmem_limit):
    R_pad = G * B
    out_dtype = np.dtype(x_dtype_name)
    return jax.jit(pl.pallas_call(
        _make_rotate_kernel(B, N, img_static),
        out_shape=jax.ShapeDtypeStruct((R_pad, C, HWp), out_dtype),
        grid_spec=pltpu.PrefetchScalarGridSpec(
            num_scalar_prefetch=0,
            grid=(G,),
            in_specs=[
                pl.BlockSpec((N, C, HWp), lambda g: (0, 0, 0)),   # x: resident
                pl.BlockSpec((B, HWp, HWp), lambda g: (g, 0, 0)),  # sel tile
            ],
            out_specs=pl.BlockSpec((B, C, HWp), lambda g: (g, 0, 0)),
        ),
        compiler_params=pltpu.CompilerParams(
            dimension_semantics=("parallel",),
            vmem_limit_bytes=vmem_limit,
        ),
    ))


_MIXED_SEL_FAILED = False    # set once if mixed f32 x bf16 dot cannot lower


def rotation_forward(x: jax.Array, count: int = 360 // 30, key=None) -> jax.Array:
    """JAX/Pallas equivalent of Rotation.forward.  x: (N, C, H, W) NCHW."""
    global _MIXED_SEL_FAILED
    assert x.ndim == 4
    if key is None:
        key = jax.random.PRNGKey(0)
    N, C, H, W = x.shape
    HW = H * W
    HWp = _round_up(HW, 128)                # lane-dense last dim -> unmasked vst

    # R exactly as in the original module.
    R = len(range(0, 360, int(360.0 / count)))

    # ---- generation-aware VMEM budgeting ---------------------------------
    try:
        vmem_cap = int(pltpu.get_tpu_info().vmem_capacity_bytes)
    except Exception:
        vmem_cap = 64 << 20                 # conservative (v7x per-core VMEM)
    sel_budget = (10 << 20) if vmem_cap >= (96 << 20) else (3 << 20)

    # ---- pick B (rotations fused per step) and G (grid steps) ------------
    # B multiple of N -> static image index; G even for v7x's two TCs;
    # R is padded up to G*B instead of letting B collapse to 1.
    lcm = N if 1 < N <= 16 else 1
    B_mem = max(1, sel_budget // (HWp * HWp * 4))   # f32-equivalent footprint
    B_cap = min(B_mem, 16, max(1, R))
    B_cap = max(lcm, (B_cap // lcm) * lcm)
    G = max(2, -(-R // B_cap))
    if G % 2:
        G += 1
    B = _round_up(-(-R // G), lcm)
    G = -(-R // B)
    R_pad = G * B
    img_static = (N == 1) or (B % N == 0)

    # ---- honest VMEM estimate --------------------------------------------
    c8 = _round_up(C, 8)                    # sublane padding of (C, HWp) slabs
    vmem_need = (2 * B * HWp * HWp * 2      # double-buffered selT (bf16)
                 + B * HWp * HWp * 4        # matmul / widen temps headroom
                 + 2 * N * c8 * HWp * 4     # x block buffers
                 + 2 * B * c8 * HWp * 4     # out block buffers
                 + (2 << 20))               # Mosaic internal scratch
    vmem_limit = int(min(max(vmem_need, 32 << 20), int(vmem_cap * 0.75)))

    selT, _ = _get_selT(H, W, count, key, HWp, R_pad)   # cached host build + H2D

    # NCHW flattens directly to channels-in-sublanes, spatial-in-lanes.
    x_flat = x.reshape(N, C, HW)
    if HWp != HW:
        x_flat = jnp.pad(x_flat, ((0, 0), (0, 0), (0, HWp - HW)))

    call = _make_rotate_call(N, C, HWp, B, G, img_static, x.dtype.name, vmem_limit)
    if _MIXED_SEL_FAILED:
        selT = selT.astype(x.dtype)
    try:
        rotated = jax.block_until_ready(call(x_flat, selT))
    except Exception:
        # Fallback for stacks without mixed f32 x bf16 matmul lowering: exact
        # result, just doubles the selT stream.
        _MIXED_SEL_FAILED = True
        rotated = jax.block_until_ready(call(x_flat, selT.astype(x.dtype)))

    rotated = rotated[:R, :, :HW].reshape(R, C, H, W)
    if N == 1:
        return rotated                      # rep[R:] is empty
    # Untouched copies rep[k] = x[k % N] for k in [R, R*N): plain gather.
    tail_idx = jnp.asarray(np.arange(R, R * N) % N, dtype=jnp.int32)
    tail = jnp.take(x, tail_idx, axis=0)
    return jnp.concatenate([rotated, tail], axis=0)


if __name__ == "__main__":
    key = jax.random.PRNGKey(0)
    x = jax.random.normal(key, (2, 4, 16, 16), dtype=jnp.float32)   # NCHW
    out = rotation_forward(x, count=360 // 30, key=key)
    out = jax.block_until_ready(out)
    assert out.shape == (12 * 2, 4, 16, 16), out.shape

    xs = np.asarray(x)
    o = np.asarray(out)
    # rep[R:] are untouched copies of x (rep[k] = x[k % N] for k >= R).
    np.testing.assert_allclose(o[12], xs[0], rtol=0, atol=0)
    np.testing.assert_allclose(o[13], xs[1], rtol=0, atol=0)
    # rotation 0 has angle in [0, 1) deg: at 16x16 nearest-neighbor this is the
    # identity selection, so out[0] must reproduce x[0].
    np.testing.assert_allclose(o[0], xs[0], rtol=0, atol=1e-5)
    print("KERNEL_OK")
</pallas_src>

<mosaic_0001>
module attributes {stable_mosaic.version = 11 : i64} {
  func.func @kernel(%arg0: i32, %arg1: memref<2x4x256xf32, #tpu.memory_space<vmem>>, %arg2: memref<6x256x256xbf16, #tpu.memory_space<vmem>>, %arg3: memref<6x4x256xf32, #tpu.memory_space<vmem>>) attributes {dimension_semantics = [#tpu.dimension_semantics<parallel>], iteration_bounds = array<i64: 2>, scalar_prefetch = 0 : i64, scratch_operands = 0 : i64, tpu.core_type = #tpu.core_type<tc>, window_params = [{pipeline_mode = #tpu.pipeline_mode<synchronous>, transform_indices = @transform_0, window_bounds = array<i64: 2, 4, 256>}, {transform_indices = @transform_1, window_bounds = array<i64: 6, 256, 256>}, {transform_indices = @transform_2, window_bounds = array<i64: 6, 4, 256>}]} {
    %c0 = arith.constant 0 : index
    %c0_0 = arith.constant 0 : index
    %c0_1 = arith.constant 0 : index
    %0 = vector.load %arg1[%c0, %c0_0, %c0_1] : memref<2x4x256xf32, #tpu.memory_space<vmem>>, vector<1x4x256xf32>
    %1 = vector.shape_cast %0 : vector<1x4x256xf32> to vector<4x256xf32>
    %c0_2 = arith.constant 0 : index
    %c0_3 = arith.constant 0 : index
    %c0_4 = arith.constant 0 : index
    %2 = vector.load %arg2[%c0_2, %c0_3, %c0_4] : memref<6x256x256xbf16, #tpu.memory_space<vmem>>, vector<1x256x256xbf16>
    %3 = vector.shape_cast %2 : vector<1x256x256xbf16> to vector<256x256xbf16>
    %cst = arith.constant dense<0.000000e+00> : vector<4x256xf32>
    %4 = tpu.matmul %1, %3, %cst {dimension_numbers = #tpu.dot_dimension_numbers<[1], [0], [0], [1], [0, 0, 1, 1], [], []>} : vector<4x256xf32>, vector<256x256xbf16>, vector<4x256xf32> -> vector<4x256xf32>
    %c0_5 = arith.constant 0 : index
    %c0_6 = arith.constant 0 : index
    %c0_7 = arith.constant 0 : index
    %5 = vector.load %arg3[%c0_5, %c0_6, %c0_7] : memref<6x4x256xf32, #tpu.memory_space<vmem>>, vector<1x4x256xf32>
    %6 = vector.shape_cast %5 : vector<1x4x256xf32> to vector<4x256xf32>
    %7 = vector.shape_cast %4 : vector<4x256xf32> to vector<1x4x256xf32>
    tpu.vector_store %arg3[%c0_5, %c0_6, %c0_7], %7 {strides = array<i32>} : memref<6x4x256xf32, #tpu.memory_space<vmem>>, vector<1x4x256xf32>,
    %c1 = arith.constant 1 : index
    %c0_8 = arith.constant 0 : index
    %c0_9 = arith.constant 0 : index
    %8 = vector.load %arg1[%c1, %c0_8, %c0_9] : memref<2x4x256xf32, #tpu.memory_space<vmem>>, vector<1x4x256xf32>
    %9 = vector.shape_cast %8 : vector<1x4x256xf32> to vector<4x256xf32>
    %c1_10 = arith.constant 1 : index
    %c0_11 = arith.constant 0 : index
    %c0_12 = arith.constant 0 : index
    %10 = vector.load %arg2[%c1_10, %c0_11, %c0_12] : memref<6x256x256xbf16, #tpu.memory_space<vmem>>, vector<1x256x256xbf16>
    %11 = vector.shape_cast %10 : vector<1x256x256xbf16> to vector<256x256xbf16>
    %cst_13 = arith.constant dense<0.000000e+00> : vector<4x256xf32>
    %12 = tpu.matmul %9, %11, %cst_13 {dimension_numbers = #tpu.dot_dimension_numbers<[1], [0], [0], [1], [0, 0, 1, 1], [], []>} : vector<4x256xf32>, vector<256x256xbf16>, vector<4x256xf32> -> vector<4x256xf32>
    %c1_14 = arith.constant 1 : index
    %c0_15 = arith.constant 0 : index
    %c0_16 = arith.constant 0 : index
    %13 = vector.load %arg3[%c1_14, %c0_15, %c0_16] : memref<6x4x256xf32, #tpu.memory_space<vmem>>, vector<1x4x256xf32>
    %14 = vector.shape_cast %13 : vector<1x4x256xf32> to vector<4x256xf32>
    %15 = vector.shape_cast %12 : vector<4x256xf32> to vector<1x4x256xf32>
    tpu.vector_store %arg3[%c1_14, %c0_15, %c0_16], %15 {strides = array<i32>} : memref<6x4x256xf32, #tpu.memory_space<vmem>>, vector<1x4x256xf32>,
    %c0_17 = arith.constant 0 : index
    %c0_18 = arith.constant 0 : index
    %c0_19 = arith.constant 0 : index
    %16 = vector.load %arg1[%c0_17, %c0_18, %c0_19] : memref<2x4x256xf32, #tpu.memory_space<vmem>>, vector<1x4x256xf32>
    %17 = vector.shape_cast %16 : vector<1x4x256xf32> to vector<4x256xf32>
    %c2 = arith.constant 2 : index
    %c0_20 = arith.constant 0 : index
    %c0_21 = arith.constant 0 : index
    %18 = vector.load %arg2[%c2, %c0_20, %c0_21] : memref<6x256x256xbf16, #tpu.memory_space<vmem>>, vector<1x256x256xbf16>
    %19 = vector.shape_cast %18 : vector<1x256x256xbf16> to vector<256x256xbf16>
    %cst_22 = arith.constant dense<0.000000e+00> : vector<4x256xf32>
    %20 = tpu.matmul %17, %19, %cst_22 {dimension_numbers = #tpu.dot_dimension_numbers<[1], [0], [0], [1], [0, 0, 1, 1], [], []>} : vector<4x256xf32>, vector<256x256xbf16>, vector<4x256xf32> -> vector<4x256xf32>
    %c2_23 = arith.constant 2 : index
    %c0_24 = arith.constant 0 : index
    %c0_25 = arith.constant 0 : index
    %21 = vector.load %arg3[%c2_23, %c0_24, %c0_25] : memref<6x4x256xf32, #tpu.memory_space<vmem>>, vector<1x4x256xf32>
    %22 = vector.shape_cast %21 : vector<1x4x256xf32> to vector<4x256xf32>
    %23 = vector.shape_cast %20 : vector<4x256xf32> to vector<1x4x256xf32>
    tpu.vector_store %arg3[%c2_23, %c0_24, %c0_25], %23 {strides = array<i32>} : memref<6x4x256xf32, #tpu.memory_space<vmem>>, vector<1x4x256xf32>,
    %c1_26 = arith.constant 1 : index
    %c0_27 = arith.constant 0 : index
    %c0_28 = arith.constant 0 : index
    %24 = vector.load %arg1[%c1_26, %c0_27, %c0_28] : memref<2x4x256xf32, #tpu.memory_space<vmem>>, vector<1x4x256xf32>
    %25 = vector.shape_cast %24 : vector<1x4x256xf32> to vector<4x256xf32>
    %c3 = arith.constant 3 : index
    %c0_29 = arith.constant 0 : index
    %c0_30 = arith.constant 0 : index
    %26 = vector.load %arg2[%c3, %c0_29, %c0_30] : memref<6x256x256xbf16, #tpu.memory_space<vmem>>, vector<1x256x256xbf16>
    %27 = vector.shape_cast %26 : vector<1x256x256xbf16> to vector<256x256xbf16>
    %cst_31 = arith.constant dense<0.000000e+00> : vector<4x256xf32>
    %28 = tpu.matmul %25, %27, %cst_31 {dimension_numbers = #tpu.dot_dimension_numbers<[1], [0], [0], [1], [0, 0, 1, 1], [], []>} : vector<4x256xf32>, vector<256x256xbf16>, vector<4x256xf32> -> vector<4x256xf32>
    %c3_32 = arith.constant 3 : index
    %c0_33 = arith.constant 0 : index
    %c0_34 = arith.constant 0 : index
    %29 = vector.load %arg3[%c3_32, %c0_33, %c0_34] : memref<6x4x256xf32, #tpu.memory_space<vmem>>, vector<1x4x256xf32>
    %30 = vector.shape_cast %29 : vector<1x4x256xf32> to vector<4x256xf32>
    %31 = vector.shape_cast %28 : vector<4x256xf32> to vector<1x4x256xf32>
    tpu.vector_store %arg3[%c3_32, %c0_33, %c0_34], %31 {strides = array<i32>} : memref<6x4x256xf32, #tpu.memory_space<vmem>>, vector<1x4x256xf32>,
    %c0_35 = arith.constant 0 : index
    %c0_36 = arith.constant 0 : index
    %c0_37 = arith.constant 0 : index
    %32 = vector.load %arg1[%c0_35, %c0_36, %c0_37] : memref<2x4x256xf32, #tpu.memory_space<vmem>>, vector<1x4x256xf32>
    %33 = vector.shape_cast %32 : vector<1x4x256xf32> to vector<4x256xf32>
    %c4 = arith.constant 4 : index
    %c0_38 = arith.constant 0 : index
    %c0_39 = arith.constant 0 : index
    %34 = vector.load %arg2[%c4, %c0_38, %c0_39] : memref<6x256x256xbf16, #tpu.memory_space<vmem>>, vector<1x256x256xbf16>
    %35 = vector.shape_cast %34 : vector<1x256x256xbf16> to vector<256x256xbf16>
    %cst_40 = arith.constant dense<0.000000e+00> : vector<4x256xf32>
    %36 = tpu.matmul %33, %35, %cst_40 {dimension_numbers = #tpu.dot_dimension_numbers<[1], [0], [0], [1], [0, 0, 1, 1], [], []>} : vector<4x256xf32>, vector<256x256xbf16>, vector<4x256xf32> -> vector<4x256xf32>
    %c4_41 = arith.constant 4 : index
    %c0_42 = arith.constant 0 : index
    %c0_43 = arith.constant 0 : index
    %37 = vector.load %arg3[%c4_41, %c0_42, %c0_43] : memref<6x4x256xf32, #tpu.memory_space<vmem>>, vector<1x4x256xf32>
    %38 = vector.shape_cast %37 : vector<1x4x256xf32> to vector<4x256xf32>
    %39 = vector.shape_cast %36 : vector<4x256xf32> to vector<1x4x256xf32>
    tpu.vector_store %arg3[%c4_41, %c0_42, %c0_43], %39 {strides = array<i32>} : memref<6x4x256xf32, #tpu.memory_space<vmem>>, vector<1x4x256xf32>,
    %c1_44 = arith.constant 1 : index
    %c0_45 = arith.constant 0 : index
    %c0_46 = arith.constant 0 : index
    %40 = vector.load %arg1[%c1_44, %c0_45, %c0_46] : memref<2x4x256xf32, #tpu.memory_space<vmem>>, vector<1x4x256xf32>
    %41 = vector.shape_cast %40 : vector<1x4x256xf32> to vector<4x256xf32>
    %c5 = arith.constant 5 : index
    %c0_47 = arith.constant 0 : index
    %c0_48 = arith.constant 0 : index
    %42 = vector.load %arg2[%c5, %c0_47, %c0_48] : memref<6x256x256xbf16, #tpu.memory_space<vmem>>, vector<1x256x256xbf16>
    %43 = vector.shape_cast %42 : vector<1x256x256xbf16> to vector<256x256xbf16>
    %cst_49 = arith.constant dense<0.000000e+00> : vector<4x256xf32>
    %44 = tpu.matmul %41, %43, %cst_49 {dimension_numbers = #tpu.dot_dimension_numbers<[1], [0], [0], [1], [0, 0, 1, 1], [], []>} : vector<4x256xf32>, vector<256x256xbf16>, vector<4x256xf32> -> vector<4x256xf32>
    %c5_50 = arith.constant 5 : index
    %c0_51 = arith.constant 0 : index
    %c0_52 = arith.constant 0 : index
    %45 = vector.load %arg3[%c5_50, %c0_51, %c0_52] : memref<6x4x256xf32, #tpu.memory_space<vmem>>, vector<1x4x256xf32>
    %46 = vector.shape_cast %45 : vector<1x4x256xf32> to vector<4x256xf32>
    %47 = vector.shape_cast %44 : vector<4x256xf32> to vector<1x4x256xf32>
    tpu.vector_store %arg3[%c5_50, %c0_51, %c0_52], %47 {strides = array<i32>} : memref<6x4x256xf32, #tpu.memory_space<vmem>>, vector<1x4x256xf32>,
    return
  }
  func.func @transform_0(%arg0: i32) -> (i32, i32, i32) {
    %c0_i32 = arith.constant 0 : i32
    %c0_i32_0 = arith.constant 0 : i32
    %c0_i32_1 = arith.constant 0 : i32
    %c0_i32_2 = arith.constant 0 : i32
    return %c0_i32, %c0_i32_0, %c0_i32_1 : i32, i32, i32
  }
  func.func @transform_1(%arg0: i32) -> (i32, i32, i32) {
    %c0_i32 = arith.constant 0 : i32
    %c0_i32_0 = arith.constant 0 : i32
    %c0_i32_1 = arith.constant 0 : i32
    return %arg0, %c0_i32, %c0_i32_0 : i32, i32, i32
  }
  func.func @transform_2(%arg0: i32) -> (i32, i32, i32) {
    %c0_i32 = arith.constant 0 : i32
    %c0_i32_0 = arith.constant 0 : i32
    %c0_i32_1 = arith.constant 0 : i32
    return %arg0, %c0_i32, %c0_i32_0 : i32, i32, i32
  }
}

module attributes {stable_mosaic.version = 11 : i64} {
  func.func @kernel(%arg0: i32, %arg1: memref<2x4x256xf32, #tpu.memory_space<vmem>>, %arg2: memref<6x256x256xf32, #tpu.memory_space<vmem>>, %arg3: memref<6x4x256xf32, #tpu.memory_space<vmem>>) attributes {dimension_semantics = [#tpu.dimension_semantics<parallel>], iteration_bounds = array<i64: 2>, scalar_prefetch = 0 : i64, scratch_operands = 0 : i64, tpu.core_type = #tpu.core_type<tc>, window_params = [{pipeline_mode = #tpu.pipeline_mode<synchronous>, transform_indices = @transform_0, window_bounds = array<i64: 2, 4, 256>}, {transform_indices = @transform_1, window_bounds = array<i64: 6, 256, 256>}, {transform_indices = @transform_2, window_bounds = array<i64: 6, 4, 256>}]} {
    %c0 = arith.constant 0 : index
    %c0_0 = arith.constant 0 : index
    %c0_1 = arith.constant 0 : index
    %0 = vector.load %arg1[%c0, %c0_0, %c0_1] : memref<2x4x256xf32, #tpu.memory_space<vmem>>, vector<1x4x256xf32>
    %1 = vector.shape_cast %0 : vector<1x4x256xf32> to vector<4x256xf32>
    %c0_2 = arith.constant 0 : index
    %c0_3 = arith.constant 0 : index
    %c0_4 = arith.constant 0 : index
    %2 = vector.load %arg2[%c0_2, %c0_3, %c0_4] : memref<6x256x256xf32, #tpu.memory_space<vmem>>, vector<1x256x256xf32>
    %3 = vector.shape_cast %2 : vector<1x256x256xf32> to vector<256x256xf32>
    %cst = arith.constant dense<0.000000e+00> : vector<4x256xf32>
    %4 = tpu.matmul %1, %3, %cst {dimension_numbers = #tpu.dot_dimension_numbers<[1], [0], [0], [1], [0, 0, 1, 1], [], []>} : vector<4x256xf32>, vector<256x256xf32>, vector<4x256xf32> -> vector<4x256xf32>
    %c0_5 = arith.constant 0 : index
    %c0_6 = arith.constant 0 : index
    %c0_7 = arith.constant 0 : index
    %5 = vector.load %arg3[%c0_5, %c0_6, %c0_7] : memref<6x4x256xf32, #tpu.memory_space<vmem>>, vector<1x4x256xf32>
    %6 = vector.shape_cast %5 : vector<1x4x256xf32> to vector<4x256xf32>
    %7 = vector.shape_cast %4 : vector<4x256xf32> to vector<1x4x256xf32>
    tpu.vector_store %arg3[%c0_5, %c0_6, %c0_7], %7 {strides = array<i32>} : memref<6x4x256xf32, #tpu.memory_space<vmem>>, vector<1x4x256xf32>,
    %c1 = arith.constant 1 : index
    %c0_8 = arith.constant 0 : index
    %c0_9 = arith.constant 0 : index
    %8 = vector.load %arg1[%c1, %c0_8, %c0_9] : memref<2x4x256xf32, #tpu.memory_space<vmem>>, vector<1x4x256xf32>
    %9 = vector.shape_cast %8 : vector<1x4x256xf32> to vector<4x256xf32>
    %c1_10 = arith.constant 1 : index
    %c0_11 = arith.constant 0 : index
    %c0_12 = arith.constant 0 : index
    %10 = vector.load %arg2[%c1_10, %c0_11, %c0_12] : memref<6x256x256xf32, #tpu.memory_space<vmem>>, vector<1x256x256xf32>
    %11 = vector.shape_cast %10 : vector<1x256x256xf32> to vector<256x256xf32>
    %cst_13 = arith.constant dense<0.000000e+00> : vector<4x256xf32>
    %12 = tpu.matmul %9, %11, %cst_13 {dimension_numbers = #tpu.dot_dimension_numbers<[1], [0], [0], [1], [0, 0, 1, 1], [], []>} : vector<4x256xf32>, vector<256x256xf32>, vector<4x256xf32> -> vector<4x256xf32>
    %c1_14 = arith.constant 1 : index
    %c0_15 = arith.constant 0 : index
    %c0_16 = arith.constant 0 : index
    %13 = vector.load %arg3[%c1_14, %c0_15, %c0_16] : memref<6x4x256xf32, #tpu.memory_space<vmem>>, vector<1x4x256xf32>
    %14 = vector.shape_cast %13 : vector<1x4x256xf32> to vector<4x256xf32>
    %15 = vector.shape_cast %12 : vector<4x256xf32> to vector<1x4x256xf32>
    tpu.vector_store %arg3[%c1_14, %c0_15, %c0_16], %15 {strides = array<i32>} : memref<6x4x256xf32, #tpu.memory_space<vmem>>, vector<1x4x256xf32>,
    %c0_17 = arith.constant 0 : index
    %c0_18 = arith.constant 0 : index
    %c0_19 = arith.constant 0 : index
    %16 = vector.load %arg1[%c0_17, %c0_18, %c0_19] : memref<2x4x256xf32, #tpu.memory_space<vmem>>, vector<1x4x256xf32>
    %17 = vector.shape_cast %16 : vector<1x4x256xf32> to vector<4x256xf32>
    %c2 = arith.constant 2 : index
    %c0_20 = arith.constant 0 : index
    %c0_21 = arith.constant 0 : index
    %18 = vector.load %arg2[%c2, %c0_20, %c0_21] : memref<6x256x256xf32, #tpu.memory_space<vmem>>, vector<1x256x256xf32>
    %19 = vector.shape_cast %18 : vector<1x256x256xf32> to vector<256x256xf32>
    %cst_22 = arith.constant dense<0.000000e+00> : vector<4x256xf32>
    %20 = tpu.matmul %17, %19, %cst_22 {dimension_numbers = #tpu.dot_dimension_numbers<[1], [0], [0], [1], [0, 0, 1, 1], [], []>} : vector<4x256xf32>, vector<256x256xf32>, vector<4x256xf32> -> vector<4x256xf32>
    %c2_23 = arith.constant 2 : index
    %c0_24 = arith.constant 0 : index
    %c0_25 = arith.constant 0 : index
    %21 = vector.load %arg3[%c2_23, %c0_24, %c0_25] : memref<6x4x256xf32, #tpu.memory_space<vmem>>, vector<1x4x256xf32>
    %22 = vector.shape_cast %21 : vector<1x4x256xf32> to vector<4x256xf32>
    %23 = vector.shape_cast %20 : vector<4x256xf32> to vector<1x4x256xf32>
    tpu.vector_store %arg3[%c2_23, %c0_24, %c0_25], %23 {strides = array<i32>} : memref<6x4x256xf32, #tpu.memory_space<vmem>>, vector<1x4x256xf32>,
    %c1_26 = arith.constant 1 : index
    %c0_27 = arith.constant 0 : index
    %c0_28 = arith.constant 0 : index
    %24 = vector.load %arg1[%c1_26, %c0_27, %c0_28] : memref<2x4x256xf32, #tpu.memory_space<vmem>>, vector<1x4x256xf32>
    %25 = vector.shape_cast %24 : vector<1x4x256xf32> to vector<4x256xf32>
    %c3 = arith.constant 3 : index
    %c0_29 = arith.constant 0 : index
    %c0_30 = arith.constant 0 : index
    %26 = vector.load %arg2[%c3, %c0_29, %c0_30] : memref<6x256x256xf32, #tpu.memory_space<vmem>>, vector<1x256x256xf32>
    %27 = vector.shape_cast %26 : vector<1x256x256xf32> to vector<256x256xf32>
    %cst_31 = arith.constant dense<0.000000e+00> : vector<4x256xf32>
    %28 = tpu.matmul %25, %27, %cst_31 {dimension_numbers = #tpu.dot_dimension_numbers<[1], [0], [0], [1], [0, 0, 1, 1], [], []>} : vector<4x256xf32>, vector<256x256xf32>, vector<4x256xf32> -> vector<4x256xf32>
    %c3_32 = arith.constant 3 : index
    %c0_33 = arith.constant 0 : index
    %c0_34 = arith.constant 0 : index
    %29 = vector.load %arg3[%c3_32, %c0_33, %c0_34] : memref<6x4x256xf32, #tpu.memory_space<vmem>>, vector<1x4x256xf32>
    %30 = vector.shape_cast %29 : vector<1x4x256xf32> to vector<4x256xf32>
    %31 = vector.shape_cast %28 : vector<4x256xf32> to vector<1x4x256xf32>
    tpu.vector_store %arg3[%c3_32, %c0_33, %c0_34], %31 {strides = array<i32>} : memref<6x4x256xf32, #tpu.memory_space<vmem>>, vector<1x4x256xf32>,
    %c0_35 = arith.constant 0 : index
    %c0_36 = arith.constant 0 : index
    %c0_37 = arith.constant 0 : index
    %32 = vector.load %arg1[%c0_35, %c0_36, %c0_37] : memref<2x4x256xf32, #tpu.memory_space<vmem>>, vector<1x4x256xf32>
    %33 = vector.shape_cast %32 : vector<1x4x256xf32> to vector<4x256xf32>
    %c4 = arith.constant 4 : index
    %c0_38 = arith.constant 0 : index
    %c0_39 = arith.constant 0 : index
    %34 = vector.load %arg2[%c4, %c0_38, %c0_39] : memref<6x256x256xf32, #tpu.memory_space<vmem>>, vector<1x256x256xf32>
    %35 = vector.shape_cast %34 : vector<1x256x256xf32> to vector<256x256xf32>
    %cst_40 = arith.constant dense<0.000000e+00> : vector<4x256xf32>
    %36 = tpu.matmul %33, %35, %cst_40 {dimension_numbers = #tpu.dot_dimension_numbers<[1], [0], [0], [1], [0, 0, 1, 1], [], []>} : vector<4x256xf32>, vector<256x256xf32>, vector<4x256xf32> -> vector<4x256xf32>
    %c4_41 = arith.constant 4 : index
    %c0_42 = arith.constant 0 : index
    %c0_43 = arith.constant 0 : index
    %37 = vector.load %arg3[%c4_41, %c0_42, %c0_43] : memref<6x4x256xf32, #tpu.memory_space<vmem>>, vector<1x4x256xf32>
    %38 = vector.shape_cast %37 : vector<1x4x256xf32> to vector<4x256xf32>
    %39 = vector.shape_cast %36 : vector<4x256xf32> to vector<1x4x256xf32>
    tpu.vector_store %arg3[%c4_41, %c0_42, %c0_43], %39 {strides = array<i32>} : memref<6x4x256xf32, #tpu.memory_space<vmem>>, vector<1x4x256xf32>,
    %c1_44 = arith.constant 1 : index
    %c0_45 = arith.constant 0 : index
    %c0_46 = arith.constant 0 : index
    %40 = vector.load %arg1[%c1_44, %c0_45, %c0_46] : memref<2x4x256xf32, #tpu.memory_space<vmem>>, vector<1x4x256xf32>
    %41 = vector.shape_cast %40 : vector<1x4x256xf32> to vector<4x256xf32>
    %c5 = arith.constant 5 : index
    %c0_47 = arith.constant 0 : index
    %c0_48 = arith.constant 0 : index
    %42 = vector.load %arg2[%c5, %c0_47, %c0_48] : memref<6x256x256xf32, #tpu.memory_space<vmem>>, vector<1x256x256xf32>
    %43 = vector.shape_cast %42 : vector<1x256x256xf32> to vector<256x256xf32>
    %cst_49 = arith.constant dense<0.000000e+00> : vector<4x256xf32>
    %44 = tpu.matmul %41, %43, %cst_49 {dimension_numbers = #tpu.dot_dimension_numbers<[1], [0], [0], [1], [0, 0, 1, 1], [], []>} : vector<4x256xf32>, vector<256x256xf32>, vector<4x256xf32> -> vector<4x256xf32>
    %c5_50 = arith.constant 5 : index
    %c0_51 = arith.constant 0 : index
    %c0_52 = arith.constant 0 : index
    %45 = vector.load %arg3[%c5_50, %c0_51, %c0_52] : memref<6x4x256xf32, #tpu.memory_space<vmem>>, vector<1x4x256xf32>
    %46 = vector.shape_cast %45 : vector<1x4x256xf32> to vector<4x256xf32>
    %47 = vector.shape_cast %44 : vector<4x256xf32> to vector<1x4x256xf32>
    tpu.vector_store %arg3[%c5_50, %c0_51, %c0_52], %47 {strides = array<i32>} : memref<6x4x256xf32, #tpu.memory_space<vmem>>, vector<1x4x256xf32>,
    return
  }
  func.func @transform_0(%arg0: i32) -> (i32, i32, i32) {
    %c0_i32 = arith.constant 0 : i32
    %c0_i32_0 = arith.constant 0 : i32
    %c0_i32_1 = arith.constant 0 : i32
    %c0_i32_2 = arith.constant 0 : i32
    return %c0_i32, %c0_i32_0, %c0_i32_1 : i32, i32, i32
  }
  func.func @transform_1(%arg0: i32) -> (i32, i32, i32) {
    %c0_i32 = arith.constant 0 : i32
    %c0_i32_0 = arith.constant 0 : i32
    %c0_i32_1 = arith.constant 0 : i32
    return %arg0, %c0_i32, %c0_i32_0 : i32, i32, i32
  }
  func.func @transform_2(%arg0: i32) -> (i32, i32, i32) {
    %c0_i32 = arith.constant 0 : i32
    %c0_i32_0 = arith.constant 0 : i32
    %c0_i32_1 = arith.constant 0 : i32
    return %arg0, %c0_i32, %c0_i32_0 : i32, i32, i32
  }
}

</mosaic_0001>

<bundles_post_ra>
// kernel: tpu_custom_call.1
= control target key start
LH: loop header
LB: loop body
LE: loop exit
PB: predicated region body
PF: predicated region fallthrough
CT: control target
= control target key end

     0   :  { %7 = vsyncpa [#allocation3], 0  ;;  %s3038_s0 = inlined_call_operand.hbm [shape: f32[2,4,256], index: 0, kind: input, shape index: {}]   ;;  %s3039_s1 = inlined_call_operand.hbm [shape: bf16[12,256,256], index: 1, kind: input, shape index: {}]   ;;  %s3040_s2 = inlined_call_operand.hbm [shape: f32[12,4,256], index: 2, kind: output, shape index: {}]  }
   0x1   :  { %8 = vsyncpa [#allocation6], 0 }
   0x2   :  { %10 = vsyncpa [#allocation6 + $0x1], 0 }
   0x3   :  { %11 = vsyncpa [#allocation4], 0 }
   0x4   :  { %13 = vsyncpa [#allocation4 + $0x1], 0  ;;  %s2612_s9 = smov 0   ;;  %s2614_s10 = smov 0  }
   0x5   :  { %s2616_s11 = smov 0   ;;  %s2618_s12 = smov 0  }
   0x6 LB: > { %s2633_s13 = sadd.s32 4294967295, %s2588_s12   ;;  %s1731_s14 = sadd.s32 4294967294, %s2588_s12   ;;  %s2588_s12 = sphi %s2618_s12, %s3060_s12   ;;  %s2584_s11 = sphi %s2616_s11, %s3059_s11   ;;  %s2580_s10 = sphi %s2614_s10, %s3058_s10   ;;  %s2576_s9 = sphi %s2612_s9, %s3057_s9  }
   0x7   : > { %p60_p0 = scmp.ne.s32.totalorder %s2580_s10, %s2576_s9  ;;  %p3041_p1 = scmp.eq.s32.totalorder %s2633_s13, 0 }
   0x8   : > { %p90_p3 = scmp.eq.s32.totalorder %s1731_s14, 1  ;;  %p1732_p5 = scmp.ge.s32.totalorder %s2588_s12, 1 }
   0x9   : > { %p2642_p4 = por %p3041_p1, %p60_p0  ;;  %p97_p7 = scmp.lt.s32.totalorder %s2588_s12, 3 }
   0xa   : > { %p2647_p6 = por %p90_p3, %p60_p0  ;;  %s2590_s18 = smov [#allocation2]  }
   0xb   : > { %s3044_s15 = scalar_select %p2642_p4, 1, 0 }
   0xc   : > { %s3045_s16 = scalar_select %p2647_p6, 1, 0 }
   0xd   : > { %p2652_p8 = pnand %p1732_p5, %p97_p7  ;;  %s109_s19 = sshll.u32 %s2590_s18, 4  ;;  %s2656_s19 = int_to_ptr.vmem [resolvable:$true] %s109_s19 }
   0xe   : > { %s2668_s21 = sadd.s32 1, %s2588_s12   ;;  %s47_s22 = sadd.s32 1, %s2584_s11 }
   0xf   : > { %s3046_s17 = scalar_select %p2652_p8, 1, 0 }
  0x10   : > { %p2117_p9 = pneg %p2652_p8  ;;  %s44_s23 = ssub.s32 %s2588_s12, %s2668_s21 }
  0x11   : > { %s2460_s26 = scalar_lea.hbm %s3038_s0, 256 }
  0x12   : > { %p2663_p11 = pnand %p2117_p9, %p3041_p1  ;;  %p2461_p12 = scmp.ne.s32.totalorder %s3038_s0, %s2460_s26 }
  0x13   : > { %p2467_p5 = scmp.lt.u32.totalorder %s2460_s26, %s3038_s0 }
  0x14   : > { %p2462_p13 = pneg %p2663_p11 }
  0x16   : > { %p2463_p0 = pnand %p2462_p13, %p2461_p12 }
  0x18   : > { %p2464_p3 = pneg %p2463_p0 }
  0x1a   : > { %p2469_p7 = pnand %p2467_p5, %p2464_p3 }
  0x1c   : > { %2472 = shalt.err (!%p2469_p7)
}
  0x1d   : > { %s2473_s3 = scalar_lea.vmem %s2656_s19, 256  ;;  %p2481_p2 = scmp.lt.s32.totalorder %s2656_s19, %s2656_s19 }
  0x1e   : > { %p2474_p9 = scmp.ne.s32.totalorder %s2656_s19, %s2473_s3  ;;  %p2482_p6 = scmp.lt.s32.totalorder %s2473_s3, %s2473_s3 }
  0x20   : > { %p2476_p10 = pnand %p2474_p9, %p2462_p13  ;;  %p2483_p4 = por %p2482_p6, %p2481_p2 }
  0x22   : > { %p2477_p1 = pneg %p2476_p10 }
  0x24   : > { %p2484_p8 = pnand %p2483_p4, %p2477_p1 }
  0x26   : > { %2487 = shalt.err (!%p2484_p8)
}
  0x27   : > { %s2591_s4 = smov 128   ;;  %s2592_s5 = smov 8  }
  0x28   : > { %2120 = dma.hbm_to_vmem [thread:$0]  (!%p2663_p11), %s3038_s0, 256, %s2656_s19, [#allocation3], %s2591_s4, %s2591_s4, %s2592_s5  }
  0x29   : > { %p45_p1 = scmp.eq.s32.totalorder %s44_s23, 0  ;;  %p54_p2 = scmp.ne.s32.totalorder %s2584_s11, %s2580_s10 }
  0x2a   : > { %p55_p4 = scmp.eq.s32.totalorder %s2588_s12, 0  ;;  %p2130_p6 = scmp.lt.s32.totalorder %s2588_s12, 2 }
  0x2b   : > { %s2702_s8 = scalar_select %p45_p1, %s2584_s11, %s47_s22  }
  0x2c   : > { %p56_p8 = por %p55_p4, %p54_p2  ;;  %p3048_p10 = scmp.eq.s32.totalorder %s2633_s13, 1 }
  0x2d   : > { %s123_s18 = sand.u32 1, %s2584_s11   ;;  %s2104_s20 = smul.u32 24576, %s2588_s12 }
  0x2e   : > { %p2706_p12 = por %p3048_p10, %p54_p2  ;;  %s2106_s24 = smul.u32 1536, %s123_s18 }
  0x2f   : > { %p2712_p13 = pnand %p2130_p6, %p56_p8  ;;  %s2719_s22 = scalar_lea.hbm %s3039_s1, %s2104_s20 }
  0x30   : > { %s127_s26 = scalar_lea.vmem [#allocation5], %s2106_s24  ;;  %s2723_s28 = scalar_lea.sflag [#allocation6], %s123_s18 }
  0x31   : > { %s135_s27 = sshll.u32 %s127_s26, 4  ;;  %s2488_s29 = scalar_lea.hbm %s2719_s22, 24576  ;;  %s2721_s27 = int_to_ptr.vmem [resolvable:$true] %s135_s27 }
  0x32   : > { %p2489_p11 = scmp.ne.s32.totalorder %s2719_s22, %s2488_s29  ;;  %p2490_p0 = pneg %p2712_p13 }
  0x33   : > { %s2493_s6 = scalar_lea.hbm %s3039_s1, 49152  ;;  %p2494_p7 = scmp.lt.u32.totalorder %s2719_s22, %s3039_s1 }
  0x34   : > { %p2491_p3 = pnand %p2490_p0, %p2489_p11  ;;  %p2495_p9 = scmp.lt.u32.totalorder %s2493_s6, %s2488_s29 }
  0x35   : > { %p2497_p2 = scmp.lt.u32.totalorder %s2488_s29, %s2719_s22 }
  0x36   : > { %p2492_p5 = pneg %p2491_p3  ;;  %p2496_p1 = por %p2495_p9, %p2494_p7 }
  0x38   : > { %p2498_p4 = por %p2497_p2, %p2496_p1 }
  0x3a   : > { %p2499_p6 = pnand %p2498_p4, %p2492_p5 }
  0x3c   : > { %2502 = shalt.err (!%p2499_p6)
}
  0x3d   : > { %s2503_s18 = scalar_lea.vmem %s2721_s27, 24576  ;;  %s2593_s24 = smov [#allocation5]  }
  0x3e   : > { %p2504_p8 = scmp.ne.s32.totalorder %s2721_s27, %s2503_s18  ;;  %s2508_s19 = sshll.u32 %s2593_s24, 4  ;;  %s2509_s19 = int_to_ptr.vmem [resolvable:$false] %s2508_s19 }
  0x3f   : > { %s2510_s23 = scalar_lea.vmem %s2509_s19, 49152  ;;  %p2511_p3 = scmp.lt.s32.totalorder %s2721_s27, %s2509_s19 }
  0x40   : > { %p2506_p10 = pnand %p2504_p8, %p2490_p0  ;;  %p2512_p7 = scmp.lt.s32.totalorder %s2510_s23, %s2503_s18 }
  0x42   : > { %p2507_p11 = pneg %p2506_p10  ;;  %p2513_p9 = por %p2512_p7, %p2511_p3 }
  0x44   : > { %p2514_p1 = pnand %p2513_p9, %p2507_p11 }
  0x46   : > { %2517 = shalt.err (!%p2514_p1)
}
  0x47   : > { %2124 = dma.hbm_to_vmem [thread:$0]  (!%p2712_p13), %s2719_s22, 24576, %s2721_s27, %s2723_s28, %s2591_s4, %s2591_s4, %s2592_s5  }
  0x48   : > { %p3051_p0 = scmp.ne.s32.totalorder %s3046_s17, 0 }
  0x49   : > { %p3052_p5 = scmp.eq.s32.totalorder (!%p3051_p0), %s2633_s13, 0 }
  0x4a   : > { %147 = sbr.rel (%p3051_p0) target bundleno = 511 (0x1ff), region = 28 }
  0x51   : > { %2563 = dma.done.wait (%p3052_p5), [#allocation3], 256   ;;  %p3053_p2 = pmov %p3052_p5 }
  0x52   : > { %s2761_s26 = sand.u32 1, %s2580_s10   ;;  %p3054_p13 = scmp.ne.s32.totalorder %s3044_s15, 0 }
  0x53   : > { %2565 = vsyncadd (%p3053_p2), [#allocation3], 4294967040  ;;  %s2107_s25 = smul.u32 1536, %s2761_s26  ;;  %s154_s29 = scalar_lea.sflag [#allocation6], %s2761_s26 }
  0x55   : > { %s2765_s30 = scalar_lea.vmem [#allocation5], %s2107_s25 }
  0x56   : > { %2567 = dma.done.wait (%p3054_p13), %s154_s29, 24576  }
  0x57   : > { %2569 = vsyncadd (%p3054_p13), %s154_s29, 4294942720  ;;  %v2170_v0 = vld [vmem:[%s2765_s30 + $0x4] ss:$8 sps:$4 sm:$0xff]   ;;  %v2174_v2 = vld [vmem:[%s2765_s30] ss:$8 sps:$4 sm:$0xff]   ;;  %s2108_s15 = smul.u32 48, %s2761_s26 }
  0x58   : > { %v2172_v1 = vld [vmem:[%s2765_s30 + $0x104] ss:$8 sps:$4 sm:$0xff]   ;;  %376 = vmatprep.subr.bf16.mxu0 %v2170_v0  ;;  %v2175_v3 = vld [vmem:[%s2765_s30 + $0x100] ss:$8 sps:$4 sm:$0xff]   ;;  %v2176_v4 = vld [vmem:[%s2765_s30 + $0x14] ss:$8 sps:$4 sm:$0xff]  }
  0x59   : > { %618 = vmatprep.subr.bf16.mxu1 %v2172_v1  ;;  %377 = vmatpush1.bf16.msra.mxu0 %v2174_v2  ;;  %v2178_v5 = vld [vmem:[%s2765_s30 + $0x114] ss:$8 sps:$4 sm:$0xff]   ;;  %v2180_v6 = vld [vmem:[%s2765_s30 + $0x10] ss:$8 sps:$4 sm:$0xff]   ;;  %v2182_v8 = vld [vmem:[%s2765_s30 + $0x24] ss:$8 sps:$4 sm:$0xff]  }
  0x5a   : > { %619 = vmatpush1.bf16.msra.mxu1 %v2175_v3  ;;  %378 = vmatprep.subr.bf16.mxu0 %v2176_v4  ;;  %v2181_v7 = vld [vmem:[%s2765_s30 + $0x110] ss:$8 sps:$4 sm:$0xff]   ;;  %v2184_v9 = vld [vmem:[%s2765_s30 + $0x124] ss:$8 sps:$4 sm:$0xff]   ;;  %v2186_v10 = vld [vmem:[%s2765_s30 + $0x20] ss:$8 sps:$4 sm:$0xff]  }
  0x5b   : > { %620 = vmatprep.subr.bf16.mxu1 %v2178_v5  ;;  %v2187_v11 = vld [vmem:[%s2765_s30 + $0x120] ss:$8 sps:$4 sm:$0xff]   ;;  %v2188_v12 = vld [vmem:[%s2765_s30 + $0x34] ss:$8 sps:$4 sm:$0xff]   ;;  %v2192_v14 = vld [vmem:[%s2765_s30 + $0x30] ss:$8 sps:$4 sm:$0xff]  }
  0x5c   : > { %v2190_v13 = vld [vmem:[%s2765_s30 + $0x134] ss:$8 sps:$4 sm:$0xff]   ;;  %v2193_v15 = vld [vmem:[%s2765_s30 + $0x130] ss:$8 sps:$4 sm:$0xff]   ;;  %v2194_v16 = vld [vmem:[%s2765_s30 + $0x44] ss:$8 sps:$4 sm:$0xff]  }
  0x5d   : > { %379 = vmatpush1.bf16.msra.mxu0 %v2180_v6  ;;  %v2196_v17 = vld [vmem:[%s2765_s30 + $0x144] ss:$8 sps:$4 sm:$0xff]   ;;  %v2198_v18 = vld [vmem:[%s2765_s30 + $0x40] ss:$8 sps:$4 sm:$0xff]   ;;  %v2200_v20 = vld [vmem:[%s2765_s30 + $0x54] ss:$8 sps:$4 sm:$0xff]  }
  0x5e   : > { %621 = vmatpush1.bf16.msra.mxu1 %v2181_v7  ;;  %380 = vmatprep.subr.bf16.mxu0 %v2182_v8  ;;  %v2199_v19 = vld [vmem:[%s2765_s30 + $0x140] ss:$8 sps:$4 sm:$0xff]   ;;  %v2202_v21 = vld [vmem:[%s2765_s30 + $0x154] ss:$8 sps:$4 sm:$0xff]   ;;  %v2204_v22 = vld [vmem:[%s2765_s30 + $0x50] ss:$8 sps:$4 sm:$0xff]  }
  0x5f   : > { %622 = vmatprep.subr.bf16.mxu1 %v2184_v9  ;;  %v2205_v23 = vld [vmem:[%s2765_s30 + $0x150] ss:$8 sps:$4 sm:$0xff]   ;;  %v2206_v24 = vld [vmem:[%s2765_s30 + $0x64] ss:$8 sps:$4 sm:$0xff]   ;;  %v2210_v26 = vld [vmem:[%s2765_s30 + $0x60] ss:$8 sps:$4 sm:$0xff]  }
  0x60   : > { %v2208_v25 = vld [vmem:[%s2765_s30 + $0x164] ss:$8 sps:$4 sm:$0xff]   ;;  %v2211_v27 = vld [vmem:[%s2765_s30 + $0x160] ss:$8 sps:$4 sm:$0xff]   ;;  %v2212_v28 = vld [vmem:[%s2765_s30 + $0x74] ss:$8 sps:$4 sm:$0xff]  }
  0x61   : > { %381 = vmatpush1.bf16.msra.mxu0 %v2186_v10  ;;  %v2214_v29 = vld [vmem:[%s2765_s30 + $0x174] ss:$8 sps:$4 sm:$0xff]   ;;  %v2216_v30 = vld [vmem:[%s2765_s30 + $0x70] ss:$8 sps:$4 sm:$0xff]   ;;  %v2218_v32 = vld [vmem:[%s2765_s30 + $0x84] ss:$8 sps:$4 sm:$0xff]  }
  0x62   : > { %623 = vmatpush1.bf16.msra.mxu1 %v2187_v11  ;;  %382 = vmatprep.subr.bf16.mxu0 %v2188_v12  ;;  %v2217_v31 = vld [vmem:[%s2765_s30 + $0x170] ss:$8 sps:$4 sm:$0xff]   ;;  %v2220_v33 = vld [vmem:[%s2765_s30 + $0x184] ss:$8 sps:$4 sm:$0xff]   ;;  %v2222_v34 = vld [vmem:[%s2765_s30 + $0x80] ss:$8 sps:$4 sm:$0xff]  }
  0x63   : > { %624 = vmatprep.subr.bf16.mxu1 %v2190_v13  ;;  %v2223_v35 = vld [vmem:[%s2765_s30 + $0x180] ss:$8 sps:$4 sm:$0xff]   ;;  %v2224_v36 = vld [vmem:[%s2765_s30 + $0x94] ss:$8 sps:$4 sm:$0xff]   ;;  %v2228_v38 = vld [vmem:[%s2765_s30 + $0x90] ss:$8 sps:$4 sm:$0xff]  }
  0x64   : > { %v2226_v37 = vld [vmem:[%s2765_s30 + $0x194] ss:$8 sps:$4 sm:$0xff]   ;;  %v2229_v39 = vld [vmem:[%s2765_s30 + $0x190] ss:$8 sps:$4 sm:$0xff]   ;;  %v2230_v40 = vld [vmem:[%s2765_s30 + $0xa4] ss:$8 sps:$4 sm:$0xff]  }
  0x65   : > { %383 = vmatpush1.bf16.msra.mxu0 %v2192_v14  ;;  %v2232_v41 = vld [vmem:[%s2765_s30 + $0x1a4] ss:$8 sps:$4 sm:$0xff]   ;;  %v2234_v42 = vld [vmem:[%s2765_s30 + $0xa0] ss:$8 sps:$4 sm:$0xff]   ;;  %v2236_v44 = vld [vmem:[%s2765_s30 + $0xb4] ss:$8 sps:$4 sm:$0xff]  }
  0x66   : > { %625 = vmatpush1.bf16.msra.mxu1 %v2193_v15  ;;  %384 = vmatprep.subr.bf16.mxu0 %v2194_v16  ;;  %v2235_v43 = vld [vmem:[%s2765_s30 + $0x1a0] ss:$8 sps:$4 sm:$0xff]   ;;  %v2238_v45 = vld [vmem:[%s2765_s30 + $0x1b4] ss:$8 sps:$4 sm:$0xff]   ;;  %v2240_v49 = vld [vmem:[%s2765_s30 + $0xb0] ss:$8 sps:$4 sm:$0xff]  }
  0x67   : > { %626 = vmatprep.subr.bf16.mxu1 %v2196_v17  ;;  %v2817_v46 = vld [vmem:[#allocation2] sm:$0xff]  ;;  %v2823_v48 = vld [vmem:[#allocation2 + $0x8] sm:$0xff]  ;;  %v2242_v52 = vld [vmem:[%s2765_s30 + $0xc4] ss:$8 sps:$4 sm:$0xff]   ;;  %s177_s17 = scalar_lea.vmem [#allocation7], %s2108_s15  ;;  %s2105_s5 = smul.u32 768, %s2633_s13 }
  0x68   : > { %v2821_v47 = vcombine.high %v2817_v46, %v2817_v46  ;;  %v2241_v50 = vld [vmem:[%s2765_s30 + $0x1b0] ss:$8 sps:$4 sm:$0xff]   ;;  %v2829_v51 = vcombine.high %v2823_v48, %v2823_v48  ;;  %v2244_v53 = vld [vmem:[%s2765_s30 + $0x1c4] ss:$8 sps:$4 sm:$0xff]   ;;  %v2246_v54 = vld [vmem:[%s2765_s30 + $0xc0] ss:$8 sps:$4 sm:$0xff]  }
  0x69   : > { %385 = vmatpush1.bf16.msra.mxu0 %v2198_v18  ;;  %v2247_v55 = vld [vmem:[%s2765_s30 + $0x1c0] ss:$8 sps:$4 sm:$0xff]   ;;  %v2248_v56 = vld [vmem:[%s2765_s30 + $0xd4] ss:$8 sps:$4 sm:$0xff]   ;;  %v2252_v58 = vld [vmem:[%s2765_s30 + $0xd0] ss:$8 sps:$4 sm:$0xff]   ;;  %s2994_s28 = scalar_lea.hbm %s3040_s2, %s2105_s5 }
  0x6a   : > { %627 = vmatpush1.bf16.msra.mxu1 %v2199_v19  ;;  %386 = vmatprep.subr.bf16.mxu0 %v2200_v20  ;;  %v2250_v57 = vld [vmem:[%s2765_s30 + $0x1d4] ss:$8 sps:$4 sm:$0xff]   ;;  %v2253_v59 = vld [vmem:[%s2765_s30 + $0x1d0] ss:$8 sps:$4 sm:$0xff]   ;;  %v2254_v60 = vld [vmem:[%s2765_s30 + $0xe4] ss:$8 sps:$4 sm:$0xff]  }
  0x6b   : > { %628 = vmatprep.subr.bf16.mxu1 %v2202_v21  ;;  %408 = vmatprep.mubr.f32.mxu0 %v2821_v47  ;;  %v2256_v61 = vld [vmem:[%s2765_s30 + $0x1e4] ss:$8 sps:$4 sm:$0xff]   ;;  %v2258_v62 = vld [vmem:[%s2765_s30 + $0xe0] ss:$8 sps:$4 sm:$0xff]   ;;  %v2260_v0 = vld [vmem:[%s2765_s30 + $0xf4] ss:$8 sps:$4 sm:$0xff]  }
  0x6c   : > { %650 = vmatprep.mubr.f32.mxu1 %v2829_v51  ;;  %v2259_v63 = vld [vmem:[%s2765_s30 + $0x1e0] ss:$8 sps:$4 sm:$0xff]   ;;  %v2262_v1 = vld [vmem:[%s2765_s30 + $0x1f4] ss:$8 sps:$4 sm:$0xff]   ;;  %v2264_v2 = vld [vmem:[%s2765_s30 + $0xf0] ss:$8 sps:$4 sm:$0xff]  }
  0x6d   : > { %387 = vmatpush1.bf16.msra.mxu0 %v2204_v22  ;;  %v2265_v3 = vld [vmem:[%s2765_s30 + $0x1f0] ss:$8 sps:$4 sm:$0xff]   ;;  %v2270_v4 = vld [vmem:[%s2765_s30 + $0x204] ss:$8 sps:$4 sm:$0xff]   ;;  %v2268_v6 = vld [vmem:[%s2765_s30 + $0x200] ss:$8 sps:$4 sm:$0xff]  }
  0x6e   : > { %629 = vmatpush1.bf16.msra.mxu1 %v2205_v23  ;;  %388 = vmatprep.subr.bf16.mxu0 %v2206_v24  ;;  %v2273_v5 = vld [vmem:[%s2765_s30 + $0x304] ss:$8 sps:$4 sm:$0xff]   ;;  %v2271_v7 = vld [vmem:[%s2765_s30 + $0x300] ss:$8 sps:$4 sm:$0xff]   ;;  %v2276_v8 = vld [vmem:[%s2765_s30 + $0x214] ss:$8 sps:$4 sm:$0xff]  }
  0x6f   : > { %630 = vmatprep.subr.bf16.mxu1 %v2208_v25  ;;  %v2279_v9 = vld [vmem:[%s2765_s30 + $0x314] ss:$8 sps:$4 sm:$0xff]   ;;  %v2274_v10 = vld [vmem:[%s2765_s30 + $0x210] ss:$8 sps:$4 sm:$0xff]   ;;  %v2282_v12 = vld [vmem:[%s2765_s30 + $0x224] ss:$8 sps:$4 sm:$0xff]  }
  0x70   : > { %v2277_v11 = vld [vmem:[%s2765_s30 + $0x310] ss:$8 sps:$4 sm:$0xff]   ;;  %v2285_v13 = vld [vmem:[%s2765_s30 + $0x324] ss:$8 sps:$4 sm:$0xff]   ;;  %v2280_v14 = vld [vmem:[%s2765_s30 + $0x220] ss:$8 sps:$4 sm:$0xff]  }
  0x71   : > { %389 = vmatpush1.bf16.msra.mxu0 %v2210_v26  ;;  %v2283_v15 = vld [vmem:[%s2765_s30 + $0x320] ss:$8 sps:$4 sm:$0xff]   ;;  %v2288_v16 = vld [vmem:[%s2765_s30 + $0x234] ss:$8 sps:$4 sm:$0xff]   ;;  %v2286_v18 = vld [vmem:[%s2765_s30 + $0x230] ss:$8 sps:$4 sm:$0xff]  }
  0x72   : > { %631 = vmatpush1.bf16.msra.mxu1 %v2211_v27  ;;  %390 = vmatprep.subr.bf16.mxu0 %v2212_v28  ;;  %v2291_v17 = vld [vmem:[%s2765_s30 + $0x334] ss:$8 sps:$4 sm:$0xff]   ;;  %v2289_v19 = vld [vmem:[%s2765_s30 + $0x330] ss:$8 sps:$4 sm:$0xff]   ;;  %v2294_v20 = vld [vmem:[%s2765_s30 + $0x244] ss:$8 sps:$4 sm:$0xff]  }
  0x73   : > { %632 = vmatprep.subr.bf16.mxu1 %v2214_v29  ;;  %v2297_v21 = vld [vmem:[%s2765_s30 + $0x344] ss:$8 sps:$4 sm:$0xff]   ;;  %v2292_v22 = vld [vmem:[%s2765_s30 + $0x240] ss:$8 sps:$4 sm:$0xff]   ;;  %v2300_v24 = vld [vmem:[%s2765_s30 + $0x254] ss:$8 sps:$4 sm:$0xff]  }
  0x74   : > { %v2295_v23 = vld [vmem:[%s2765_s30 + $0x340] ss:$8 sps:$4 sm:$0xff]   ;;  %v2303_v25 = vld [vmem:[%s2765_s30 + $0x354] ss:$8 sps:$4 sm:$0xff]   ;;  %v2298_v26 = vld [vmem:[%s2765_s30 + $0x250] ss:$8 sps:$4 sm:$0xff]  }
  0x75   : > { %391 = vmatpush1.bf16.msra.mxu0 %v2216_v30  ;;  %v2301_v27 = vld [vmem:[%s2765_s30 + $0x350] ss:$8 sps:$4 sm:$0xff]   ;;  %v2306_v28 = vld [vmem:[%s2765_s30 + $0x264] ss:$8 sps:$4 sm:$0xff]   ;;  %v2304_v30 = vld [vmem:[%s2765_s30 + $0x260] ss:$8 sps:$4 sm:$0xff]  }
  0x76   : > { %633 = vmatpush1.bf16.msra.mxu1 %v2217_v31  ;;  %392 = vmatprep.subr.bf16.mxu0 %v2218_v32  ;;  %v2309_v29 = vld [vmem:[%s2765_s30 + $0x364] ss:$8 sps:$4 sm:$0xff]   ;;  %v2307_v31 = vld [vmem:[%s2765_s30 + $0x360] ss:$8 sps:$4 sm:$0xff]   ;;  %v2312_v32 = vld [vmem:[%s2765_s30 + $0x274] ss:$8 sps:$4 sm:$0xff]  }
  0x77   : > { %634 = vmatprep.subr.bf16.mxu1 %v2220_v33  ;;  %v2315_v33 = vld [vmem:[%s2765_s30 + $0x374] ss:$8 sps:$4 sm:$0xff]   ;;  %s1646_s4 = sshll.u32 %s177_s17, 4  ;;  %s1632_s3 = scalar_lea.sflag [#allocation4], %s2761_s26  ;;  %s2989_s4 = int_to_ptr.vmem [resolvable:$true] %s1646_s4 }
  0x78   : > { %s2518_s13 = scalar_lea.vmem %s2989_s4, 768  ;;  %s2594_s6 = smov [#allocation7]  }
  0x79   : > { %393 = vmatpush1.bf16.msra.mxu0 %v2222_v34  ;;  %v2310_v34 = vld [vmem:[%s2765_s30 + $0x270] ss:$8 sps:$4 sm:$0xff]   ;;  %p2519_p4 = scmp.ne.s32.totalorder %s2989_s4, %s2518_s13  ;;  %s2522_s7 = sshll.u32 %s2594_s6, 4  ;;  %s2523_s7 = int_to_ptr.vmem [resolvable:$false] %s2522_s7 }
  0x7a   : > { %635 = vmatpush1.bf16.msra.mxu1 %v2223_v35  ;;  %394 = vmatprep.subr.bf16.mxu0 %v2224_v36  ;;  %v2313_v35 = vld [vmem:[%s2765_s30 + $0x370] ss:$8 sps:$4 sm:$0xff]   ;;  %v2318_v36 = vld [vmem:[%s2765_s30 + $0x284] ss:$8 sps:$4 sm:$0xff]   ;;  %s2524_s20 = scalar_lea.vmem %s2523_s7, 1536  ;;  %p2525_p10 = scmp.lt.s32.totalorder %s2989_s4, %s2523_s7 }
  0x7b   : > { %636 = vmatprep.subr.bf16.mxu1 %v2226_v37  ;;  %v2321_v37 = vld [vmem:[%s2765_s30 + $0x384] ss:$8 sps:$4 sm:$0xff]   ;;  %p2520_p6 = pnand %p2519_p4, %p2706_p12  ;;  %p2526_p11 = scmp.lt.s32.totalorder %s2524_s20, %s2518_s13 }
  0x7d   : > { %395 = vmatpush1.bf16.msra.mxu0 %v2228_v38  ;;  %v2316_v38 = vld [vmem:[%s2765_s30 + $0x280] ss:$8 sps:$4 sm:$0xff]   ;;  %p2521_p8 = pneg %p2520_p6  ;;  %p2527_p3 = por %p2526_p11, %p2525_p10 }
  0x7e   : > { %637 = vmatpush1.bf16.msra.mxu1 %v2229_v39  ;;  %396 = vmatprep.subr.bf16.mxu0 %v2230_v40  ;;  %v2319_v39 = vld [vmem:[%s2765_s30 + $0x380] ss:$8 sps:$4 sm:$0xff]   ;;  %v2324_v40 = vld [vmem:[%s2765_s30 + $0x294] ss:$8 sps:$4 sm:$0xff]  }
  0x7f   : > { %638 = vmatprep.subr.bf16.mxu1 %v2232_v41  ;;  %v2327_v41 = vld [vmem:[%s2765_s30 + $0x394] ss:$8 sps:$4 sm:$0xff]   ;;  %p2528_p7 = pnand %p2527_p3, %p2521_p8 }
  0x81   : > { %397 = vmatpush1.bf16.msra.mxu0 %v2234_v42  ;;  %v2322_v42 = vld [vmem:[%s2765_s30 + $0x290] ss:$8 sps:$4 sm:$0xff]  }
  0x82   : > { %639 = vmatpush1.bf16.msra.mxu1 %v2235_v43  ;;  %398 = vmatprep.subr.bf16.mxu0 %v2236_v44  ;;  %v2325_v43 = vld [vmem:[%s2765_s30 + $0x390] ss:$8 sps:$4 sm:$0xff]   ;;  %v2330_v44 = vld [vmem:[%s2765_s30 + $0x2a4] ss:$8 sps:$4 sm:$0xff]  }
  0x83   : > { %640 = vmatprep.subr.bf16.mxu1 %v2238_v45  ;;  %v2333_v45 = vld [vmem:[%s2765_s30 + $0x3a4] ss:$8 sps:$4 sm:$0xff]  }
  0x85   : > { %399 = vmatpush1.bf16.msra.mxu0 %v2240_v49  ;;  %v2328_v49 = vld [vmem:[%s2765_s30 + $0x2a0] ss:$8 sps:$4 sm:$0xff]  }
  0x86   : > { %641 = vmatpush1.bf16.msra.mxu1 %v2241_v50  ;;  %400 = vmatprep.subr.bf16.mxu0 %v2242_v52  ;;  %v2331_v50 = vld [vmem:[%s2765_s30 + $0x3a0] ss:$8 sps:$4 sm:$0xff]   ;;  %v2336_v52 = vld [vmem:[%s2765_s30 + $0x2b4] ss:$8 sps:$4 sm:$0xff]  }
  0x87   : > { %642 = vmatprep.subr.bf16.mxu1 %v2244_v53  ;;  %v2339_v53 = vld [vmem:[%s2765_s30 + $0x3b4] ss:$8 sps:$4 sm:$0xff]  }
  0x89   : > { %401 = vmatpush1.bf16.msra.mxu0 %v2246_v54  ;;  %v2334_v54 = vld [vmem:[%s2765_s30 + $0x2b0] ss:$8 sps:$4 sm:$0xff]  }
  0x8a   : > { %643 = vmatpush1.bf16.msra.mxu1 %v2247_v55  ;;  %402 = vmatprep.subr.bf16.mxu0 %v2248_v56  ;;  %v2337_v55 = vld [vmem:[%s2765_s30 + $0x3b0] ss:$8 sps:$4 sm:$0xff]   ;;  %v2342_v56 = vld [vmem:[%s2765_s30 + $0x2c4] ss:$8 sps:$4 sm:$0xff]  }
  0x8b   : > { %644 = vmatprep.subr.bf16.mxu1 %v2250_v57  ;;  %v2345_v57 = vld [vmem:[%s2765_s30 + $0x3c4] ss:$8 sps:$4 sm:$0xff]  }
  0x8d   : > { %403 = vmatpush1.bf16.msra.mxu0 %v2252_v58  ;;  %v2340_v58 = vld [vmem:[%s2765_s30 + $0x2c0] ss:$8 sps:$4 sm:$0xff]  }
  0x8e   : > { %645 = vmatpush1.bf16.msra.mxu1 %v2253_v59  ;;  %404 = vmatprep.subr.bf16.mxu0 %v2254_v60  ;;  %v2343_v59 = vld [vmem:[%s2765_s30 + $0x3c0] ss:$8 sps:$4 sm:$0xff]   ;;  %v2348_v60 = vld [vmem:[%s2765_s30 + $0x2d4] ss:$8 sps:$4 sm:$0xff]  }
  0x8f   : > { %646 = vmatprep.subr.bf16.mxu1 %v2256_v61  ;;  %v2351_v61 = vld [vmem:[%s2765_s30 + $0x3d4] ss:$8 sps:$4 sm:$0xff]  }
  0x91   : > { %405 = vmatpush1.bf16.msra.mxu0 %v2258_v62  ;;  %v2346_v62 = vld [vmem:[%s2765_s30 + $0x2d0] ss:$8 sps:$4 sm:$0xff]  }
  0x92   : > { %647 = vmatpush1.bf16.msra.mxu1 %v2259_v63  ;;  %406 = vmatprep.subr.bf16.mxu0 %v2260_v0  ;;  %v2349_v63 = vld [vmem:[%s2765_s30 + $0x3d0] ss:$8 sps:$4 sm:$0xff]   ;;  %v2354_v0 = vld [vmem:[%s2765_s30 + $0x2e4] ss:$8 sps:$4 sm:$0xff]  }
  0x93   : > { %648 = vmatprep.subr.bf16.mxu1 %v2262_v1  ;;  %v2357_v1 = vld [vmem:[%s2765_s30 + $0x3e4] ss:$8 sps:$4 sm:$0xff]  }
  0x95   : > { %407 = vmatpush1.bf16.msra.mxu0 %v2264_v2  ;;  %v2352_v2 = vld [vmem:[%s2765_s30 + $0x2e0] ss:$8 sps:$4 sm:$0xff]  }
  0x96   : > { %649 = vmatpush1.bf16.msra.mxu1 %v2265_v3  ;;  %860 = vmatprep.subr.bf16.mxu0 %v2270_v4  ;;  %v2355_v3 = vld [vmem:[%s2765_s30 + $0x3e0] ss:$8 sps:$4 sm:$0xff]   ;;  %v2360_v4 = vld [vmem:[%s2765_s30 + $0x2f4] ss:$8 sps:$4 sm:$0xff]  }
  0x97   : > { %1102 = vmatprep.subr.bf16.mxu1 %v2273_v5  ;;  %v2363_v5 = vld [vmem:[%s2765_s30 + $0x3f4] ss:$8 sps:$4 sm:$0xff]  }
  0x98   : > { %409 = vmatmul.mubr.f32.vlgmr.msra.gmra.mrb[0].mxu0 %v2817_v46 }
  0x99   : > { %651 = vmatmul.mubr.f32.vlgmr.msra.gmra.mrb[0].mxu1 %v2823_v48  ;;  %861 = vmatpush1.bf16.msra.mxu0 %v2268_v6  ;;  %v2358_v6 = vld [vmem:[%s2765_s30 + $0x2f0] ss:$8 sps:$4 sm:$0xff]  }
  0x9a   : > { %1103 = vmatpush1.bf16.msra.mxu1 %v2271_v7  ;;  %862 = vmatprep.subr.bf16.mxu0 %v2276_v8  ;;  %v2361_v7 = vld [vmem:[%s2765_s30 + $0x3f0] ss:$8 sps:$4 sm:$0xff]   ;;  %v2366_v8 = vld [vmem:[%s2765_s30 + $0x404] ss:$8 sps:$4 sm:$0xff]  }
  0x9b   : > { %1104 = vmatprep.subr.bf16.mxu1 %v2279_v9  ;;  %892 = vmatprep.mubr.f32.mxu0 %v2821_v47  ;;  %v2369_v9 = vld [vmem:[%s2765_s30 + $0x504] ss:$8 sps:$4 sm:$0xff]  }
  0x9c   : > { %1134 = vmatprep.mubr.f32.mxu1 %v2829_v51 }
  0x9d   : > { %863 = vmatpush1.bf16.msra.mxu0 %v2274_v10  ;;  %v2364_v10 = vld [vmem:[%s2765_s30 + $0x400] ss:$8 sps:$4 sm:$0xff]  }
  0x9e   : > { %1105 = vmatpush1.bf16.msra.mxu1 %v2277_v11  ;;  %864 = vmatprep.subr.bf16.mxu0 %v2282_v12  ;;  %v2367_v11 = vld [vmem:[%s2765_s30 + $0x500] ss:$8 sps:$4 sm:$0xff]   ;;  %v2372_v12 = vld [vmem:[%s2765_s30 + $0x414] ss:$8 sps:$4 sm:$0xff]  }
  0x9f   : > { %1106 = vmatprep.subr.bf16.mxu1 %v2285_v13  ;;  %v2375_v13 = vld [vmem:[%s2765_s30 + $0x514] ss:$8 sps:$4 sm:$0xff]  }
  0xa1   : > { %865 = vmatpush1.bf16.msra.mxu0 %v2280_v14  ;;  %v2370_v14 = vld [vmem:[%s2765_s30 + $0x410] ss:$8 sps:$4 sm:$0xff]  }
  0xa2   : > { %1107 = vmatpush1.bf16.msra.mxu1 %v2283_v15  ;;  %866 = vmatprep.subr.bf16.mxu0 %v2288_v16  ;;  %v2373_v15 = vld [vmem:[%s2765_s30 + $0x510] ss:$8 sps:$4 sm:$0xff]   ;;  %v2378_v16 = vld [vmem:[%s2765_s30 + $0x424] ss:$8 sps:$4 sm:$0xff]  }
  0xa3   : > { %1108 = vmatprep.subr.bf16.mxu1 %v2291_v17  ;;  %v2381_v17 = vld [vmem:[%s2765_s30 + $0x524] ss:$8 sps:$4 sm:$0xff]  }
  0xa5   : > { %867 = vmatpush1.bf16.msra.mxu0 %v2286_v18  ;;  %v2376_v18 = vld [vmem:[%s2765_s30 + $0x420] ss:$8 sps:$4 sm:$0xff]  }
  0xa6   : > { %1109 = vmatpush1.bf16.msra.mxu1 %v2289_v19  ;;  %868 = vmatprep.subr.bf16.mxu0 %v2294_v20  ;;  %v2379_v19 = vld [vmem:[%s2765_s30 + $0x520] ss:$8 sps:$4 sm:$0xff]   ;;  %v2384_v20 = vld [vmem:[%s2765_s30 + $0x434] ss:$8 sps:$4 sm:$0xff]  }
  0xa7   : > { %1110 = vmatprep.subr.bf16.mxu1 %v2297_v21  ;;  %v2387_v21 = vld [vmem:[%s2765_s30 + $0x534] ss:$8 sps:$4 sm:$0xff]  }
  0xa9   : > { %869 = vmatpush1.bf16.msra.mxu0 %v2292_v22  ;;  %v2382_v22 = vld [vmem:[%s2765_s30 + $0x430] ss:$8 sps:$4 sm:$0xff]  }
  0xaa   : > { %1111 = vmatpush1.bf16.msra.mxu1 %v2295_v23  ;;  %870 = vmatprep.subr.bf16.mxu0 %v2300_v24  ;;  %v2393_v23 = vld [vmem:[%s2765_s30 + $0x544] ss:$8 sps:$4 sm:$0xff]   ;;  %v2388_v24 = vld [vmem:[%s2765_s30 + $0x440] ss:$8 sps:$4 sm:$0xff]  }
  0xab   : > { %1112 = vmatprep.subr.bf16.mxu1 %v2303_v25  ;;  %v2391_v25 = vld [vmem:[%s2765_s30 + $0x540] ss:$8 sps:$4 sm:$0xff]  }
  0xad   : > { %871 = vmatpush1.bf16.msra.mxu0 %v2298_v26  ;;  %v2396_v26 = vld [vmem:[%s2765_s30 + $0x454] ss:$8 sps:$4 sm:$0xff]  }
  0xae   : > { %1113 = vmatpush1.bf16.msra.mxu1 %v2301_v27  ;;  %872 = vmatprep.subr.bf16.mxu0 %v2306_v28  ;;  %v2399_v27 = vld [vmem:[%s2765_s30 + $0x554] ss:$8 sps:$4 sm:$0xff]   ;;  %v2394_v28 = vld [vmem:[%s2765_s30 + $0x450] ss:$8 sps:$4 sm:$0xff]  }
  0xaf   : > { %1114 = vmatprep.subr.bf16.mxu1 %v2309_v29  ;;  %v2397_v29 = vld [vmem:[%s2765_s30 + $0x550] ss:$8 sps:$4 sm:$0xff]  }
  0xb1   : > { %873 = vmatpush1.bf16.msra.mxu0 %v2304_v30  ;;  %v2402_v30 = vld [vmem:[%s2765_s30 + $0x464] ss:$8 sps:$4 sm:$0xff]  }
  0xb2   : > { %1115 = vmatpush1.bf16.msra.mxu1 %v2307_v31  ;;  %874 = vmatprep.subr.bf16.mxu0 %v2312_v32  ;;  %v2405_v31 = vld [vmem:[%s2765_s30 + $0x564] ss:$8 sps:$4 sm:$0xff]   ;;  %v2400_v32 = vld [vmem:[%s2765_s30 + $0x460] ss:$8 sps:$4 sm:$0xff]  }
  0xb3   : > { %1116 = vmatprep.subr.bf16.mxu1 %v2315_v33  ;;  %v2403_v33 = vld [vmem:[%s2765_s30 + $0x560] ss:$8 sps:$4 sm:$0xff]  }
  0xb5   : > { %875 = vmatpush1.bf16.msra.mxu0 %v2310_v34  ;;  %v2408_v34 = vld [vmem:[%s2765_s30 + $0x474] ss:$8 sps:$4 sm:$0xff]  }
  0xb6   : > { %1117 = vmatpush1.bf16.msra.mxu1 %v2313_v35  ;;  %876 = vmatprep.subr.bf16.mxu0 %v2318_v36  ;;  %v2411_v35 = vld [vmem:[%s2765_s30 + $0x574] ss:$8 sps:$4 sm:$0xff]   ;;  %v2406_v36 = vld [vmem:[%s2765_s30 + $0x470] ss:$8 sps:$4 sm:$0xff]  }
  0xb7   : > { %1118 = vmatprep.subr.bf16.mxu1 %v2321_v37  ;;  %v2409_v37 = vld [vmem:[%s2765_s30 + $0x570] ss:$8 sps:$4 sm:$0xff]  }
  0xb9   : > { %877 = vmatpush1.bf16.msra.mxu0 %v2316_v38  ;;  %v2414_v38 = vld [vmem:[%s2765_s30 + $0x484] ss:$8 sps:$4 sm:$0xff]  }
  0xba   : > { %1119 = vmatpush1.bf16.msra.mxu1 %v2319_v39  ;;  %878 = vmatprep.subr.bf16.mxu0 %v2324_v40  ;;  %v2417_v39 = vld [vmem:[%s2765_s30 + $0x584] ss:$8 sps:$4 sm:$0xff]   ;;  %v2412_v40 = vld [vmem:[%s2765_s30 + $0x480] ss:$8 sps:$4 sm:$0xff]  }
  0xbb   : > { %1120 = vmatprep.subr.bf16.mxu1 %v2327_v41  ;;  %v2415_v41 = vld [vmem:[%s2765_s30 + $0x580] ss:$8 sps:$4 sm:$0xff]  }
  0xbd   : > { %879 = vmatpush1.bf16.msra.mxu0 %v2322_v42  ;;  %v2420_v42 = vld [vmem:[%s2765_s30 + $0x494] ss:$8 sps:$4 sm:$0xff]  }
  0xbe   : > { %1121 = vmatpush1.bf16.msra.mxu1 %v2325_v43  ;;  %880 = vmatprep.subr.bf16.mxu0 %v2330_v44  ;;  %v2423_v43 = vld [vmem:[%s2765_s30 + $0x594] ss:$8 sps:$4 sm:$0xff]   ;;  %v2418_v44 = vld [vmem:[%s2765_s30 + $0x490] ss:$8 sps:$4 sm:$0xff]  }
  0xbf   : > { %1122 = vmatprep.subr.bf16.mxu1 %v2333_v45  ;;  %v2421_v45 = vld [vmem:[%s2765_s30 + $0x590] ss:$8 sps:$4 sm:$0xff]  }
  0xc1   : > { %881 = vmatpush1.bf16.msra.mxu0 %v2328_v49  ;;  %v2426_v49 = vld [vmem:[%s2765_s30 + $0x4a4] ss:$8 sps:$4 sm:$0xff]  }
  0xc2   : > { %1123 = vmatpush1.bf16.msra.mxu1 %v2331_v50  ;;  %882 = vmatprep.subr.bf16.mxu0 %v2336_v52  ;;  %v2429_v50 = vld [vmem:[%s2765_s30 + $0x5a4] ss:$8 sps:$4 sm:$0xff]   ;;  %v2424_v52 = vld [vmem:[%s2765_s30 + $0x4a0] ss:$8 sps:$4 sm:$0xff]  }
  0xc3   : > { %1124 = vmatprep.subr.bf16.mxu1 %v2339_v53  ;;  %v2427_v53 = vld [vmem:[%s2765_s30 + $0x5a0] ss:$8 sps:$4 sm:$0xff]  }
  0xc5   : > { %883 = vmatpush1.bf16.msra.mxu0 %v2334_v54  ;;  %v2432_v54 = vld [vmem:[%s2765_s30 + $0x4b4] ss:$8 sps:$4 sm:$0xff]  }
  0xc6   : > { %1125 = vmatpush1.bf16.msra.mxu1 %v2337_v55  ;;  %884 = vmatprep.subr.bf16.mxu0 %v2342_v56  ;;  %v2435_v55 = vld [vmem:[%s2765_s30 + $0x5b4] ss:$8 sps:$4 sm:$0xff]   ;;  %v2430_v56 = vld [vmem:[%s2765_s30 + $0x4b0] ss:$8 sps:$4 sm:$0xff]  }
  0xc7   : > { %1126 = vmatprep.subr.bf16.mxu1 %v2345_v57  ;;  %v2433_v57 = vld [vmem:[%s2765_s30 + $0x5b0] ss:$8 sps:$4 sm:$0xff]  }
  0xc9   : > { %885 = vmatpush1.bf16.msra.mxu0 %v2340_v58  ;;  %v2438_v58 = vld [vmem:[%s2765_s30 + $0x4c4] ss:$8 sps:$4 sm:$0xff]  }
  0xca   : > { %1127 = vmatpush1.bf16.msra.mxu1 %v2343_v59  ;;  %886 = vmatprep.subr.bf16.mxu0 %v2348_v60  ;;  %v2441_v59 = vld [vmem:[%s2765_s30 + $0x5c4] ss:$8 sps:$4 sm:$0xff]   ;;  %v2436_v60 = vld [vmem:[%s2765_s30 + $0x4c0] ss:$8 sps:$4 sm:$0xff]  }
  0xcb   : > { %1128 = vmatprep.subr.bf16.mxu1 %v2351_v61  ;;  %v2439_v61 = vld [vmem:[%s2765_s30 + $0x5c0] ss:$8 sps:$4 sm:$0xff]  }
  0xcd   : > { %887 = vmatpush1.bf16.msra.mxu0 %v2346_v62  ;;  %v2444_v62 = vld [vmem:[%s2765_s30 + $0x4d4] ss:$8 sps:$4 sm:$0xff]  }
  0xce   : > { %1129 = vmatpush1.bf16.msra.mxu1 %v2349_v63  ;;  %888 = vmatprep.subr.bf16.mxu0 %v2354_v0  ;;  %v2447_v63 = vld [vmem:[%s2765_s30 + $0x5d4] ss:$8 sps:$4 sm:$0xff]   ;;  %v2442_v0 = vld [vmem:[%s2765_s30 + $0x4d0] ss:$8 sps:$4 sm:$0xff]  }
  0xcf   : > { %1130 = vmatprep.subr.bf16.mxu1 %v2357_v1  ;;  %v2445_v1 = vld [vmem:[%s2765_s30 + $0x5d0] ss:$8 sps:$4 sm:$0xff]  }
  0xd1   : > { %889 = vmatpush1.bf16.msra.mxu0 %v2352_v2  ;;  %v2450_v2 = vld [vmem:[%s2765_s30 + $0x4e4] ss:$8 sps:$4 sm:$0xff]  }
  0xd2   : > { %1131 = vmatpush1.bf16.msra.mxu1 %v2355_v3  ;;  %890 = vmatprep.subr.bf16.mxu0 %v2360_v4  ;;  %v2453_v3 = vld [vmem:[%s2765_s30 + $0x5e4] ss:$8 sps:$4 sm:$0xff]   ;;  %v2448_v4 = vld [vmem:[%s2765_s30 + $0x4e0] ss:$8 sps:$4 sm:$0xff]  }
  0xd3   : > { %1132 = vmatprep.subr.bf16.mxu1 %v2363_v5  ;;  %v2451_v5 = vld [vmem:[%s2765_s30 + $0x5e0] ss:$8 sps:$4 sm:$0xff]  }
  0xd5   : > { %891 = vmatpush1.bf16.msra.mxu0 %v2358_v6  ;;  %v2456_v6 = vld [vmem:[%s2765_s30 + $0x4f4] ss:$8 sps:$4 sm:$0xff]  }
  0xd6   : > { %1133 = vmatpush1.bf16.msra.mxu1 %v2361_v7  ;;  %1344 = vmatprep.subr.bf16.mxu0 %v2366_v8  ;;  %v2459_v7 = vld [vmem:[%s2765_s30 + $0x5f4] ss:$8 sps:$4 sm:$0xff]   ;;  %v2454_v8 = vld [vmem:[%s2765_s30 + $0x4f0] ss:$8 sps:$4 sm:$0xff]  }
  0xd7   : > { %1586 = vmatprep.subr.bf16.mxu1 %v2369_v9  ;;  %v2457_v9 = vld [vmem:[%s2765_s30 + $0x5f0] ss:$8 sps:$4 sm:$0xff]  }
  0xd8   : > { %893 = vmatmul.mubr.f32.vlgmr.msra.gmra.mrb[2].mxu0 %v2817_v46 }
  0xd9   : > { %1135 = vmatmul.mubr.f32.vlgmr.msra.gmra.mrb[2].mxu1 %v2823_v48  ;;  %1345 = vmatpush1.bf16.msra.mxu0 %v2364_v10 }
  0xda   : > { %1587 = vmatpush1.bf16.msra.mxu1 %v2367_v11  ;;  %1346 = vmatprep.subr.bf16.mxu0 %v2372_v12 }
  0xdb   : > { %1588 = vmatprep.subr.bf16.mxu1 %v2375_v13  ;;  %1376 = vmatprep.mubr.f32.mxu0 %v2821_v47  ;;  %v2385_v47 = vld [vmem:[%s2765_s30 + $0x530] ss:$8 sps:$4 sm:$0xff]  }
  0xdc   : > { %1618 = vmatprep.mubr.f32.mxu1 %v2829_v51  ;;  %v2390_v51 = vld [vmem:[%s2765_s30 + $0x444] ss:$8 sps:$4 sm:$0xff]  }
  0xdd   : > { %1347 = vmatpush1.bf16.msra.mxu0 %v2370_v14 }
  0xde   : > { %1589 = vmatpush1.bf16.msra.mxu1 %v2373_v15  ;;  %1348 = vmatprep.subr.bf16.mxu0 %v2378_v16 }
  0xdf   : > { %1590 = vmatprep.subr.bf16.mxu1 %v2381_v17 }
  0xe1   : > { %1349 = vmatpush1.bf16.msra.mxu0 %v2376_v18 }
  0xe2   : > { %1591 = vmatpush1.bf16.msra.mxu1 %v2379_v19  ;;  %1350 = vmatprep.subr.bf16.mxu0 %v2384_v20 }
  0xe3   : > { %1592 = vmatprep.subr.bf16.mxu1 %v2387_v21 }
  0xe5   : > { %1351 = vmatpush1.bf16.msra.mxu0 %v2382_v22 }
  0xe6   : > { %1593 = vmatpush1.bf16.msra.mxu1 %v2385_v47  ;;  %1352 = vmatprep.subr.bf16.mxu0 %v2390_v51 }
  0xe7   : > { %1594 = vmatprep.subr.bf16.mxu1 %v2393_v23 }
  0xe9   : > { %1353 = vmatpush1.bf16.msra.mxu0 %v2388_v24 }
  0xea   : > { %1595 = vmatpush1.bf16.msra.mxu1 %v2391_v25  ;;  %1354 = vmatprep.subr.bf16.mxu0 %v2396_v26 }
  0xeb   : > { %1596 = vmatprep.subr.bf16.mxu1 %v2399_v27 }
  0xed   : > { %1355 = vmatpush1.bf16.msra.mxu0 %v2394_v28 }
  0xee   : > { %1597 = vmatpush1.bf16.msra.mxu1 %v2397_v29  ;;  %1356 = vmatprep.subr.bf16.mxu0 %v2402_v30 }
  0xef   : > { %1598 = vmatprep.subr.bf16.mxu1 %v2405_v31 }
  0xf1   : > { %1357 = vmatpush1.bf16.msra.mxu0 %v2400_v32 }
  0xf2   : > { %1599 = vmatpush1.bf16.msra.mxu1 %v2403_v33  ;;  %1358 = vmatprep.subr.bf16.mxu0 %v2408_v34 }
  0xf3   : > { %1600 = vmatprep.subr.bf16.mxu1 %v2411_v35 }
  0xf5   : > { %1359 = vmatpush1.bf16.msra.mxu0 %v2406_v36 }
  0xf6   : > { %1601 = vmatpush1.bf16.msra.mxu1 %v2409_v37  ;;  %1360 = vmatprep.subr.bf16.mxu0 %v2414_v38 }
  0xf7   : > { %1602 = vmatprep.subr.bf16.mxu1 %v2417_v39 }
  0xf9   : > { %1361 = vmatpush1.bf16.msra.mxu0 %v2412_v40 }
  0xfa   : > { %1603 = vmatpush1.bf16.msra.mxu1 %v2415_v41  ;;  %1362 = vmatprep.subr.bf16.mxu0 %v2420_v42 }
  0xfb   : > { %1604 = vmatprep.subr.bf16.mxu1 %v2423_v43 }
  0xfd   : > { %1363 = vmatpush1.bf16.msra.mxu0 %v2418_v44 }
  0xfe   : > { %1605 = vmatpush1.bf16.msra.mxu1 %v2421_v45  ;;  %1364 = vmatprep.subr.bf16.mxu0 %v2426_v49 }
  0xff   : > { %1606 = vmatprep.subr.bf16.mxu1 %v2429_v50 }
 0x101   : > { %1365 = vmatpush1.bf16.msra.mxu0 %v2424_v52 }
 0x102   : > { %1607 = vmatpush1.bf16.msra.mxu1 %v2427_v53  ;;  %1366 = vmatprep.subr.bf16.mxu0 %v2432_v54 }
 0x103   : > { %1608 = vmatprep.subr.bf16.mxu1 %v2435_v55 }
 0x105   : > { %1367 = vmatpush1.bf16.msra.mxu0 %v2430_v56 }
 0x106   : > { %1609 = vmatpush1.bf16.msra.mxu1 %v2433_v57  ;;  %1368 = vmatprep.subr.bf16.mxu0 %v2438_v58 }
 0x107   : > { %1610 = vmatprep.subr.bf16.mxu1 %v2441_v59 }
 0x109   : > { %1369 = vmatpush1.bf16.msra.mxu0 %v2436_v60 }
 0x10a   : > { %1611 = vmatpush1.bf16.msra.mxu1 %v2439_v61  ;;  %1370 = vmatprep.subr.bf16.mxu0 %v2444_v62 }
 0x10b   : > { %1612 = vmatprep.subr.bf16.mxu1 %v2447_v63 }
 0x10d   : > { %1371 = vmatpush1.bf16.msra.mxu0 %v2442_v0 }
 0x10e   : > { %1613 = vmatpush1.bf16.msra.mxu1 %v2445_v1  ;;  %1372 = vmatprep.subr.bf16.mxu0 %v2450_v2 }
 0x10f   : > { %1614 = vmatprep.subr.bf16.mxu1 %v2453_v3 }
 0x111   : > { %1373 = vmatpush1.bf16.msra.mxu0 %v2448_v4 }
 0x112   : > { %1615 = vmatpush1.bf16.msra.mxu1 %v2451_v5  ;;  %1374 = vmatprep.subr.bf16.mxu0 %v2456_v6 }
 0x113   : > { %1616 = vmatprep.subr.bf16.mxu1 %v2459_v7 }
 0x115   : > { %1375 = vmatpush1.bf16.msra.mxu0 %v2454_v8 }
 0x116   : > { %1617 = vmatpush1.bf16.msra.mxu1 %v2457_v9 }
 0x118   : > { %1377 = vmatmul.mubr.f32.vlgmr.msra.gmra.mrb[4].mxu0 %v2817_v46 }
 0x119   : > { %1619 = vmatmul.mubr.f32.vlgmr.msra.gmra.mrb[4].mxu1 %v2823_v48 }
 0x16b   : > { %v410_v10 = vpop.f32.mrb[0].mxu0 }
 0x16c   : > { %v652_v11 = vpop.f32.mrb[0].mxu1  ;;  %v412_v12 = vpop.f32.mrb[1].mxu0 }
 0x16d   : > { %v654_v13 = vpop.f32.mrb[1].mxu1  ;;  %v417_v14 = vcombine.low %v410_v10, %v412_v12 }
 0x16e   : > { %v659_v15 = vcombine.low %v652_v11, %v654_v13 }
 0x16f   : > { %419 = vst [vmem:[%s177_s17] sm:$0xff] %v417_v14 }
 0x170   : > { %1835 = vst [vmem:[%s177_s17 + $0x8] sm:$0xff] %v659_v15 }
 0x1ab   : > { %v894_v16 = vpop.f32.mrb[2].mxu0 }
 0x1ac   : > { %v1136_v17 = vpop.f32.mrb[2].mxu1  ;;  %v896_v18 = vpop.f32.mrb[3].mxu0 }
 0x1ad   : > { %v1138_v19 = vpop.f32.mrb[3].mxu1  ;;  %v901_v20 = vcombine.low %v894_v16, %v896_v18 }
 0x1ae   : > { %v1143_v46 = vcombine.low %v1136_v17, %v1138_v19 }
 0x1af   : > { %1900 = vst [vmem:[%s177_s17 + $0x10] sm:$0xff] %v901_v20 }
 0x1b0   : > { %1965 = vst [vmem:[%s177_s17 + $0x18] sm:$0xff] %v1143_v46 }
 0x1eb   : > { %v1378_v48 = vpop.f32.mrb[4].mxu0 }
 0x1ec   : > { %v1620_v21 = vpop.f32.mrb[4].mxu1  ;;  %v1380_v22 = vpop.f32.mrb[5].mxu0 }
 0x1ed   : > { %v1622_v47 = vpop.f32.mrb[5].mxu1  ;;  %v1385_v51 = vcombine.low %v1378_v48, %v1380_v22 }
 0x1ee   : > { %v1627_v23 = vcombine.low %v1620_v21, %v1622_v47 }
 0x1ef   : > { %2030 = vst [vmem:[%s177_s17 + $0x20] sm:$0xff] %v1385_v51 }
 0x1f0   : > { %2095 = vst [vmem:[%s177_s17 + $0x28] sm:$0xff] %v1627_v23 }
 0x1f1   : > { %2531 = shalt.err (!%p2528_p7)
}
 0x1f2   : > { %s2532_s18 = scalar_lea.hbm %s2994_s28, 768  ;;  %s2536_s23 = scalar_lea.hbm %s3040_s2, 1536 }
 0x1f3   : > { %p2533_p9 = scmp.ne.s32.totalorder %s2994_s28, %s2532_s18  ;;  %p2537_p5 = scmp.lt.u32.totalorder %s2994_s28, %s3040_s2 }
 0x1f4   : > { %p2538_p2 = scmp.lt.u32.totalorder %s2536_s23, %s2532_s18  ;;  %p2540_p4 = scmp.lt.u32.totalorder %s2532_s18, %s2994_s28 }
 0x1f5   : > { %p2534_p1 = pnand %p2533_p9, %p2706_p12 }
 0x1f6   : > { %p2539_p13 = por %p2538_p2, %p2537_p5 }
 0x1f7   : > { %p2535_p0 = pneg %p2534_p1 }
 0x1f8   : > { %p2541_p6 = por %p2540_p4, %p2539_p13 }
 0x1fa   : > { %p2542_p8 = pnand %p2541_p6, %p2535_p0 }
 0x1fc   : > { %2545 = shalt.err (!%p2542_p8)
}
 0x1fd   : > { %s2595_s30 = smov 128   ;;  %s2596_s15 = smov 8  }
 0x1fe   : > { %2115 = dma.vmem_to_hbm [thread:$0]  (%p2706_p12), %s2989_s4, 768, %s2994_s28, %s1632_s3, %s2595_s30, %s2595_s30, %s2596_s15  }
 0x1ff PF: > { %s1661_s17 = sand.u32 1, %s2576_s9   ;;  %p3055_p10 = scmp.ne.s32.totalorder %s3045_s16, 0 }
 0x200   : > { %p3056_p11 = scmp.ge.s32.totalorder %s2588_s12, 2  ;;  %s1662_s5 = scalar_lea.sflag [#allocation4], %s1661_s17 }
 0x202   : > { %p2126_p3 = pnand %p3056_p11, %p3055_p10 }
 0x204   : > { %2571 = dma.done.wait (!%p2126_p3), %s1662_s5, 768  }
 0x205   : > { %2573 = vsyncadd (!%p2126_p3), %s1662_s5, 4294966528  ;;  %p16_p7 = scmp.ge.s32.totalorder %s2668_s21, 4   ;;  %s3057_s9 = smov %s2580_s10 }
 0x206   : > { %s3058_s10 = smov %s2584_s11  ;;  %s3059_s11 = smov %s2702_s8 }
 0x207   : > { %s3060_s12 = smov %s2668_s21  ;;  %18 = sbr.rel (!%p16_p7) target bundleno = 6 (0x6), region = 89 }
 0x20e   :  { %1667 = vsyncpa [#allocation3], 1 }
 0x20f   :  { %1669 = vsyncpa [#allocation3 + $0x1], 1 }
 0x210   :  { %1670 = vsyncpa [#allocation6], 1 }
 0x211   :  { %1672 = vsyncpa [#allocation6 + $0x1], 1 }
 0x212   :  { %1673 = vsyncpa [#allocation4], 1 }
 0x213   :  { %1675 = vsyncpa [#allocation4 + $0x1], 1 }

// kernel: tpu_custom_call.1
= control target key start
LH: loop header
LB: loop body
LE: loop exit
PB: predicated region body
PF: predicated region fallthrough
CT: control target
= control target key end

     0   :  { %7 = vsyncpa [#allocation3], 0  ;;  %s2724_s0 = inlined_call_operand.hbm [shape: f32[2,4,256], index: 0, kind: input, shape index: {}]   ;;  %s2725_s1 = inlined_call_operand.hbm [shape: f32[12,256,256], index: 1, kind: input, shape index: {}]   ;;  %s2726_s2 = inlined_call_operand.hbm [shape: f32[12,4,256], index: 2, kind: output, shape index: {}]  }
   0x1   :  { %8 = vsyncpa [#allocation6], 0 }
   0x2   :  { %10 = vsyncpa [#allocation6 + $0x1], 0 }
   0x3   :  { %11 = vsyncpa [#allocation4], 0 }
   0x4   :  { %13 = vsyncpa [#allocation4 + $0x1], 0  ;;  %s2106_s9 = smov 0   ;;  %s2108_s10 = smov 0  }
   0x5   :  { %s2110_s11 = smov 0   ;;  %s2112_s12 = smov 0  }
   0x6 LB: > { %s2127_s13 = sadd.s32 4294967295, %s2080_s12   ;;  %s1155_s14 = sadd.s32 4294967294, %s2080_s12   ;;  %s2080_s12 = sphi %s2112_s12, %s2746_s12   ;;  %s2076_s11 = sphi %s2110_s11, %s2745_s11   ;;  %s2072_s10 = sphi %s2108_s10, %s2744_s10   ;;  %s2068_s9 = sphi %s2106_s9, %s2743_s9  }
   0x7   : > { %p60_p0 = scmp.ne.s32.totalorder %s2072_s10, %s2068_s9  ;;  %p2727_p1 = scmp.eq.s32.totalorder %s2127_s13, 0 }
   0x8   : > { %p90_p3 = scmp.eq.s32.totalorder %s1155_s14, 1  ;;  %p1156_p5 = scmp.ge.s32.totalorder %s2080_s12, 1 }
   0x9   : > { %p2136_p4 = por %p2727_p1, %p60_p0  ;;  %p97_p7 = scmp.lt.s32.totalorder %s2080_s12, 3 }
   0xa   : > { %p2141_p6 = por %p90_p3, %p60_p0  ;;  %s2082_s18 = smov [#allocation2]  }
   0xb   : > { %s2730_s15 = scalar_select %p2136_p4, 1, 0 }
   0xc   : > { %s2731_s16 = scalar_select %p2141_p6, 1, 0 }
   0xd   : > { %p2146_p8 = pnand %p1156_p5, %p97_p7  ;;  %s109_s19 = sshll.u32 %s2082_s18, 4  ;;  %s2150_s19 = int_to_ptr.vmem [resolvable:$true] %s109_s19 }
   0xe   : > { %s2162_s21 = sadd.s32 1, %s2080_s12   ;;  %s47_s22 = sadd.s32 1, %s2076_s11 }
   0xf   : > { %s2732_s17 = scalar_select %p2146_p8, 1, 0 }
  0x10   : > { %p1893_p9 = pneg %p2146_p8  ;;  %s44_s23 = ssub.s32 %s2080_s12, %s2162_s21 }
  0x11   : > { %s1952_s26 = scalar_lea.hbm %s2724_s0, 256 }
  0x12   : > { %p2157_p11 = pnand %p1893_p9, %p2727_p1  ;;  %p1953_p12 = scmp.ne.s32.totalorder %s2724_s0, %s1952_s26 }
  0x13   : > { %p1959_p5 = scmp.lt.u32.totalorder %s1952_s26, %s2724_s0 }
  0x14   : > { %p1954_p13 = pneg %p2157_p11 }
  0x16   : > { %p1955_p0 = pnand %p1954_p13, %p1953_p12 }
  0x18   : > { %p1956_p3 = pneg %p1955_p0 }
  0x1a   : > { %p1961_p7 = pnand %p1959_p5, %p1956_p3 }
  0x1c   : > { %1964 = shalt.err (!%p1961_p7)
}
  0x1d   : > { %s1965_s3 = scalar_lea.vmem %s2150_s19, 256  ;;  %p1973_p2 = scmp.lt.s32.totalorder %s2150_s19, %s2150_s19 }
  0x1e   : > { %p1966_p9 = scmp.ne.s32.totalorder %s2150_s19, %s1965_s3  ;;  %p1974_p6 = scmp.lt.s32.totalorder %s1965_s3, %s1965_s3 }
  0x20   : > { %p1968_p10 = pnand %p1966_p9, %p1954_p13  ;;  %p1975_p4 = por %p1974_p6, %p1973_p2 }
  0x22   : > { %p1969_p1 = pneg %p1968_p10 }
  0x24   : > { %p1976_p8 = pnand %p1975_p4, %p1969_p1 }
  0x26   : > { %1979 = shalt.err (!%p1976_p8)
}
  0x27   : > { %s2083_s4 = smov 128   ;;  %s2084_s5 = smov 8  }
  0x28   : > { %1896 = dma.hbm_to_vmem [thread:$0]  (!%p2157_p11), %s2724_s0, 256, %s2150_s19, [#allocation3], %s2083_s4, %s2083_s4, %s2084_s5  }
  0x29   : > { %p45_p2 = scmp.eq.s32.totalorder %s44_s23, 0  ;;  %p54_p1 = scmp.ne.s32.totalorder %s2076_s11, %s2072_s10 }
  0x2a   : > { %p55_p4 = scmp.eq.s32.totalorder %s2080_s12, 0  ;;  %p1906_p6 = scmp.lt.s32.totalorder %s2080_s12, 2 }
  0x2b   : > { %s2193_s8 = scalar_select %p45_p2, %s2076_s11, %s47_s22  }
  0x2c   : > { %p56_p8 = por %p55_p4, %p54_p1  ;;  %p2734_p10 = scmp.eq.s32.totalorder %s2127_s13, 1 }
  0x2d   : > { %s123_s18 = sand.u32 1, %s2076_s11   ;;  %s1496_s24 = smul.u32 49152, %s2080_s12 }
  0x2e   : > { %p2197_p12 = por %p2734_p10, %p54_p1  ;;  %s1882_s25 = smul.u32 3072, %s123_s18 }
  0x2f   : > { %s2206_s27 = scalar_lea.hbm %s2725_s1, %s1496_s24  ;;  %p2208_p11 = pnand %p1906_p6, %p56_p8 }
  0x30   : > { %s127_s22 = scalar_lea.vmem [#allocation5], %s1882_s25  ;;  %s2214_s28 = scalar_lea.sflag [#allocation6], %s123_s18 }
  0x31   : > { %s135_s23 = sshll.u32 %s127_s22, 4  ;;  %s1980_s29 = scalar_lea.hbm %s2206_s27, 49152  ;;  %s2212_s23 = int_to_ptr.vmem [resolvable:$true] %s135_s23 }
  0x32   : > { %p1981_p13 = scmp.ne.s32.totalorder %s2206_s27, %s1980_s29  ;;  %p1982_p0 = pneg %p2208_p11 }
  0x33   : > { %s1985_s4 = scalar_lea.hbm %s2725_s1, 98304  ;;  %p1986_p7 = scmp.lt.u32.totalorder %s2206_s27, %s2725_s1 }
  0x34   : > { %p1983_p3 = pnand %p1982_p0, %p1981_p13  ;;  %p1987_p9 = scmp.lt.u32.totalorder %s1985_s4, %s1980_s29 }
  0x35   : > { %p1989_p1 = scmp.lt.u32.totalorder %s1980_s29, %s2206_s27 }
  0x36   : > { %p1984_p5 = pneg %p1983_p3  ;;  %p1988_p2 = por %p1987_p9, %p1986_p7 }
  0x38   : > { %p1990_p4 = por %p1989_p1, %p1988_p2 }
  0x3a   : > { %p1991_p6 = pnand %p1990_p4, %p1984_p5 }
  0x3c   : > { %1994 = shalt.err (!%p1991_p6)
}
  0x3d   : > { %s1995_s7 = scalar_lea.vmem %s2212_s23, 49152  ;;  %s2085_s18 = smov [#allocation5]  }
  0x3e   : > { %p1996_p8 = scmp.ne.s32.totalorder %s2212_s23, %s1995_s7  ;;  %s2000_s24 = sshll.u32 %s2085_s18, 4  ;;  %s2001_s24 = int_to_ptr.vmem [resolvable:$false] %s2000_s24 }
  0x3f   : > { %s2002_s25 = scalar_lea.vmem %s2001_s24, 98304  ;;  %p2003_p3 = scmp.lt.s32.totalorder %s2212_s23, %s2001_s24 }
  0x40   : > { %p1998_p10 = pnand %p1996_p8, %p1982_p0  ;;  %p2004_p7 = scmp.lt.s32.totalorder %s2002_s25, %s1995_s7 }
  0x42   : > { %p1999_p13 = pneg %p1998_p10  ;;  %p2005_p9 = por %p2004_p7, %p2003_p3 }
  0x44   : > { %p2006_p2 = pnand %p2005_p9, %p1999_p13 }
  0x46   : > { %2009 = shalt.err (!%p2006_p2)
}
  0x47   : > { %s2086_s20 = smov 256   ;;  %s2087_s26 = smov 16  }
  0x48   : > { %1900 = dma.hbm_to_vmem [thread:$0]  (!%p2208_p11), %s2206_s27, 49152, %s2212_s23, %s2214_s28, %s2086_s20, %s2086_s20, %s2087_s26  }
  0x49   : > { %p2737_p0 = scmp.ne.s32.totalorder %s2732_s17, 0 }
  0x4a   : > { %p2738_p5 = scmp.eq.s32.totalorder (!%p2737_p0), %s2127_s13, 0 }
  0x4b   : > { %147 = sbr.rel (%p2737_p0) target bundleno = 515 (0x203), region = 28 }
  0x52   : > { %2055 = dma.done.wait (%p2738_p5), [#allocation3], 256   ;;  %p2739_p1 = pmov %p2738_p5 }
  0x53   : > { %s2249_s22 = sand.u32 1, %s2072_s10   ;;  %p2740_p11 = scmp.ne.s32.totalorder %s2730_s15, 0 }
  0x54   : > { %2057 = vsyncadd (%p2739_p1), [#allocation3], 4294967040  ;;  %s1883_s29 = smul.u32 3072, %s2249_s22  ;;  %s154_s30 = scalar_lea.sflag [#allocation6], %s2249_s22 }
  0x56   : > { %s2253_s3 = scalar_lea.vmem [#allocation5], %s1883_s29 }
  0x57   : > { %2059 = dma.done.wait (%p2740_p11), %s154_s30, 49152  }
  0x58   : > { %2061 = vsyncadd (%p2740_p11), %s154_s30, 4294918144  ;;  %v182_v0 = vld [vmem:[%s2253_s3 + $0x8] sm:$0xff]  ;;  %v184_v1 = vld [vmem:[%s2253_s3 + $0x18] sm:$0xff]  ;;  %s1884_s15 = smul.u32 48, %s2249_s22  ;;  %s1056_s5 = scalar_lea.sflag [#allocation4], %s2249_s22 }
  0x59   : > { %v1164_v2 = vld [vmem:[%s2253_s3 + $0x208] sm:$0xff]  ;;  %v1498_v3 = vpack.c.bf16 %v184_v1, %v182_v0  ;;  %v1166_v4 = vld [vmem:[%s2253_s3 + $0x218] sm:$0xff]  ;;  %v181_v5 = vld [vmem:[%s2253_s3] sm:$0xff]  ;;  %s1497_s19 = smul.u32 768, %s2127_s13  ;;  %s2088_s6 = smov [#allocation7]  }
  0x5a   : > { %v183_v6 = vld [vmem:[%s2253_s3 + $0x10] sm:$0xff]  ;;  %v1562_v7 = vpack.c.bf16 %v1166_v4, %v1164_v2  ;;  %v1163_v9 = vld [vmem:[%s2253_s3 + $0x200] sm:$0xff]  ;;  %v186_v11 = vld [vmem:[%s2253_s3 + $0x28] sm:$0xff]  ;;  %s177_s17 = scalar_lea.vmem [#allocation7], %s1884_s15  ;;  %s2014_s7 = sshll.u32 %s2088_s6, 4  ;;  %s2015_s7 = int_to_ptr.vmem [resolvable:$false] %s2014_s7 }
  0x5b   : > { %v1500_v8 = vpack.c.bf16 %v183_v6, %v181_v5  ;;  %v1165_v10 = vld [vmem:[%s2253_s3 + $0x210] sm:$0xff]  ;;  %1499 = vmatprep.subr.bf16.mxu0 %v1498_v3  ;;  %v188_v13 = vld [vmem:[%s2253_s3 + $0x38] sm:$0xff]  ;;  %v1168_v14 = vld [vmem:[%s2253_s3 + $0x228] sm:$0xff]  ;;  %s1070_s27 = sshll.u32 %s177_s17, 4  ;;  %s2680_s4 = scalar_lea.hbm %s2726_s2, %s1497_s19  ;;  %s2675_s27 = int_to_ptr.vmem [resolvable:$true] %s1070_s27 }
  0x5c   : > { %v1564_v12 = vpack.c.bf16 %v1165_v10, %v1163_v9  ;;  %v1170_v15 = vld [vmem:[%s2253_s3 + $0x238] sm:$0xff]  ;;  %1563 = vmatprep.subr.bf16.mxu1 %v1562_v7  ;;  %v1502_v16 = vpack.c.bf16 %v188_v13, %v186_v11  ;;  %v185_v18 = vld [vmem:[%s2253_s3 + $0x20] sm:$0xff]  ;;  %v187_v19 = vld [vmem:[%s2253_s3 + $0x30] sm:$0xff]  ;;  %s2010_s13 = scalar_lea.vmem %s2675_s27, 768  ;;  %s2016_s18 = scalar_lea.vmem %s2015_s7, 1536 }
  0x5d   : > { %1501 = vmatpush1.bf16.msra.mxu0 %v1500_v8  ;;  %v1566_v17 = vpack.c.bf16 %v1170_v15, %v1168_v14  ;;  %v1167_v20 = vld [vmem:[%s2253_s3 + $0x220] sm:$0xff]  ;;  %v1504_v21 = vpack.c.bf16 %v187_v19, %v185_v18  ;;  %v1169_v22 = vld [vmem:[%s2253_s3 + $0x230] sm:$0xff]  ;;  %v190_v23 = vld [vmem:[%s2253_s3 + $0x48] sm:$0xff]  ;;  %p2011_p4 = scmp.ne.s32.totalorder %s2675_s27, %s2010_s13  ;;  %p2017_p10 = scmp.lt.s32.totalorder %s2675_s27, %s2015_s7 }
  0x5e   : > { %1565 = vmatpush1.bf16.msra.mxu1 %v1564_v12  ;;  %v192_v24 = vld [vmem:[%s2253_s3 + $0x58] sm:$0xff]  ;;  %1503 = vmatprep.subr.bf16.mxu0 %v1502_v16  ;;  %v1568_v25 = vpack.c.bf16 %v1169_v22, %v1167_v20  ;;  %v1172_v27 = vld [vmem:[%s2253_s3 + $0x248] sm:$0xff]  ;;  %v189_v29 = vld [vmem:[%s2253_s3 + $0x40] sm:$0xff]  ;;  %p2018_p13 = scmp.lt.s32.totalorder %s2016_s18, %s2010_s13 }
  0x5f   : > { %1567 = vmatprep.subr.bf16.mxu1 %v1566_v17  ;;  %v1506_v26 = vpack.c.bf16 %v192_v24, %v190_v23  ;;  %v1174_v28 = vld [vmem:[%s2253_s3 + $0x258] sm:$0xff]  ;;  %v191_v31 = vld [vmem:[%s2253_s3 + $0x50] sm:$0xff]  ;;  %v1171_v32 = vld [vmem:[%s2253_s3 + $0x240] sm:$0xff]  ;;  %p2012_p6 = pnand %p2011_p4, %p2197_p12 }
  0x60   : > { %v1570_v30 = vpack.c.bf16 %v1174_v28, %v1172_v27  ;;  %v1173_v33 = vld [vmem:[%s2253_s3 + $0x250] sm:$0xff]  ;;  %v1508_v34 = vpack.c.bf16 %v191_v31, %v189_v29  ;;  %v194_v35 = vld [vmem:[%s2253_s3 + $0x68] sm:$0xff]  ;;  %v196_v36 = vld [vmem:[%s2253_s3 + $0x78] sm:$0xff]  ;;  %p2019_p3 = por %p2018_p13, %p2017_p10 }
  0x61   : > { %1505 = vmatpush1.bf16.msra.mxu0 %v1504_v21  ;;  %v1176_v37 = vld [vmem:[%s2253_s3 + $0x268] sm:$0xff]  ;;  %v1572_v38 = vpack.c.bf16 %v1173_v33, %v1171_v32  ;;  %v1510_v39 = vpack.c.bf16 %v196_v36, %v194_v35  ;;  %v1178_v40 = vld [vmem:[%s2253_s3 + $0x278] sm:$0xff]  ;;  %v193_v41 = vld [vmem:[%s2253_s3 + $0x60] sm:$0xff]  ;;  %p2013_p8 = pneg %p2012_p6 }
  0x62   : > { %1569 = vmatpush1.bf16.msra.mxu1 %v1568_v25  ;;  %1507 = vmatprep.subr.bf16.mxu0 %v1506_v26  ;;  %v195_v42 = vld [vmem:[%s2253_s3 + $0x70] sm:$0xff]  ;;  %v1574_v43 = vpack.c.bf16 %v1178_v40, %v1176_v37  ;;  %v1175_v44 = vld [vmem:[%s2253_s3 + $0x260] sm:$0xff]  ;;  %v198_v46 = vld [vmem:[%s2253_s3 + $0x88] sm:$0xff] }
  0x63   : > { %1571 = vmatprep.subr.bf16.mxu1 %v1570_v30  ;;  %v1177_v45 = vld [vmem:[%s2253_s3 + $0x270] sm:$0xff]  ;;  %v200_v47 = vld [vmem:[%s2253_s3 + $0x98] sm:$0xff]  ;;  %v1180_v48 = vld [vmem:[%s2253_s3 + $0x288] sm:$0xff]  ;;  %v1512_v50 = vpack.c.bf16 %v195_v42, %v193_v41  ;;  %p2020_p7 = pnand %p2019_p3, %p2013_p8 }
  0x64   : > { %v1182_v49 = vld [vmem:[%s2253_s3 + $0x298] sm:$0xff]  ;;  %v1576_v51 = vpack.c.bf16 %v1177_v45, %v1175_v44  ;;  %v1514_v52 = vpack.c.bf16 %v200_v47, %v198_v46  ;;  %v197_v53 = vld [vmem:[%s2253_s3 + $0x80] sm:$0xff]  ;;  %v199_v54 = vld [vmem:[%s2253_s3 + $0x90] sm:$0xff] }
  0x65   : > { %1509 = vmatpush1.bf16.msra.mxu0 %v1508_v34  ;;  %v1179_v55 = vld [vmem:[%s2253_s3 + $0x280] sm:$0xff]  ;;  %v1578_v56 = vpack.c.bf16 %v1182_v49, %v1180_v48  ;;  %v1181_v57 = vld [vmem:[%s2253_s3 + $0x290] sm:$0xff]  ;;  %v202_v58 = vld [vmem:[%s2253_s3 + $0xa8] sm:$0xff]  ;;  %v1516_v62 = vpack.c.bf16 %v199_v54, %v197_v53 }
  0x66   : > { %1573 = vmatpush1.bf16.msra.mxu1 %v1572_v38  ;;  %1511 = vmatprep.subr.bf16.mxu0 %v1510_v39  ;;  %v204_v59 = vld [vmem:[%s2253_s3 + $0xb8] sm:$0xff]  ;;  %v1184_v60 = vld [vmem:[%s2253_s3 + $0x2a8] sm:$0xff]  ;;  %v1580_v63 = vpack.c.bf16 %v1181_v57, %v1179_v55  ;;  %v201_v1 = vld [vmem:[%s2253_s3 + $0xa0] sm:$0xff] }
  0x67   : > { %1575 = vmatprep.subr.bf16.mxu1 %v1574_v43  ;;  %v1186_v61 = vld [vmem:[%s2253_s3 + $0x2b8] sm:$0xff]  ;;  %v1518_v0 = vpack.c.bf16 %v204_v59, %v202_v58  ;;  %v203_v2 = vld [vmem:[%s2253_s3 + $0xb0] sm:$0xff]  ;;  %v1183_v3 = vld [vmem:[%s2253_s3 + $0x2a0] sm:$0xff] }
  0x68   : > { %v1582_v4 = vpack.c.bf16 %v1186_v61, %v1184_v60  ;;  %v1185_v5 = vld [vmem:[%s2253_s3 + $0x2b0] sm:$0xff]  ;;  %v206_v6 = vld [vmem:[%s2253_s3 + $0xc8] sm:$0xff]  ;;  %v208_v7 = vld [vmem:[%s2253_s3 + $0xd8] sm:$0xff]  ;;  %v1520_v10 = vpack.c.bf16 %v203_v2, %v201_v1 }
  0x69   : > { %1513 = vmatpush1.bf16.msra.mxu0 %v1512_v50  ;;  %v1188_v8 = vld [vmem:[%s2253_s3 + $0x2c8] sm:$0xff]  ;;  %v1190_v9 = vld [vmem:[%s2253_s3 + $0x2d8] sm:$0xff]  ;;  %v1584_v11 = vpack.c.bf16 %v1185_v5, %v1183_v3  ;;  %v1522_v12 = vpack.c.bf16 %v208_v7, %v206_v6  ;;  %v205_v13 = vld [vmem:[%s2253_s3 + $0xc0] sm:$0xff] }
  0x6a   : > { %1577 = vmatpush1.bf16.msra.mxu1 %v1576_v51  ;;  %1515 = vmatprep.subr.bf16.mxu0 %v1514_v52  ;;  %v207_v14 = vld [vmem:[%s2253_s3 + $0xd0] sm:$0xff]  ;;  %v1187_v15 = vld [vmem:[%s2253_s3 + $0x2c0] sm:$0xff]  ;;  %v1586_v16 = vpack.c.bf16 %v1190_v9, %v1188_v8  ;;  %v210_v18 = vld [vmem:[%s2253_s3 + $0xe8] sm:$0xff] }
  0x6b   : > { %1579 = vmatprep.subr.bf16.mxu1 %v1578_v56  ;;  %v1189_v17 = vld [vmem:[%s2253_s3 + $0x2d0] sm:$0xff]  ;;  %v212_v19 = vld [vmem:[%s2253_s3 + $0xf8] sm:$0xff]  ;;  %v1192_v20 = vld [vmem:[%s2253_s3 + $0x2e8] sm:$0xff]  ;;  %v1524_v22 = vpack.c.bf16 %v207_v14, %v205_v13 }
  0x6c   : > { %v1194_v21 = vld [vmem:[%s2253_s3 + $0x2f8] sm:$0xff]  ;;  %v1588_v23 = vpack.c.bf16 %v1189_v17, %v1187_v15  ;;  %v1526_v24 = vpack.c.bf16 %v212_v19, %v210_v18  ;;  %v209_v25 = vld [vmem:[%s2253_s3 + $0xe0] sm:$0xff]  ;;  %v211_v26 = vld [vmem:[%s2253_s3 + $0xf0] sm:$0xff] }
  0x6d   : > { %1517 = vmatpush1.bf16.msra.mxu0 %v1516_v62  ;;  %v1191_v27 = vld [vmem:[%s2253_s3 + $0x2e0] sm:$0xff]  ;;  %v1590_v28 = vpack.c.bf16 %v1194_v21, %v1192_v20  ;;  %v1193_v29 = vld [vmem:[%s2253_s3 + $0x2f0] sm:$0xff]  ;;  %v214_v30 = vld [vmem:[%s2253_s3 + $0x108] sm:$0xff]  ;;  %v1528_v34 = vpack.c.bf16 %v211_v26, %v209_v25 }
  0x6e   : > { %1581 = vmatpush1.bf16.msra.mxu1 %v1580_v63  ;;  %1519 = vmatprep.subr.bf16.mxu0 %v1518_v0  ;;  %v216_v31 = vld [vmem:[%s2253_s3 + $0x118] sm:$0xff]  ;;  %v1196_v32 = vld [vmem:[%s2253_s3 + $0x308] sm:$0xff]  ;;  %v1592_v35 = vpack.c.bf16 %v1193_v29, %v1191_v27  ;;  %v213_v37 = vld [vmem:[%s2253_s3 + $0x100] sm:$0xff] }
  0x6f   : > { %1583 = vmatprep.subr.bf16.mxu1 %v1582_v4  ;;  %v1198_v33 = vld [vmem:[%s2253_s3 + $0x318] sm:$0xff]  ;;  %v1530_v36 = vpack.c.bf16 %v216_v31, %v214_v30  ;;  %v215_v38 = vld [vmem:[%s2253_s3 + $0x110] sm:$0xff]  ;;  %v1195_v39 = vld [vmem:[%s2253_s3 + $0x300] sm:$0xff] }
  0x70   : > { %v1594_v40 = vpack.c.bf16 %v1198_v33, %v1196_v32  ;;  %v1197_v41 = vld [vmem:[%s2253_s3 + $0x310] sm:$0xff]  ;;  %v218_v42 = vld [vmem:[%s2253_s3 + $0x128] sm:$0xff]  ;;  %v220_v43 = vld [vmem:[%s2253_s3 + $0x138] sm:$0xff]  ;;  %v1532_v46 = vpack.c.bf16 %v215_v38, %v213_v37 }
  0x71   : > { %1521 = vmatpush1.bf16.msra.mxu0 %v1520_v10  ;;  %v1200_v44 = vld [vmem:[%s2253_s3 + $0x328] sm:$0xff]  ;;  %v1202_v45 = vld [vmem:[%s2253_s3 + $0x338] sm:$0xff]  ;;  %v1596_v47 = vpack.c.bf16 %v1197_v41, %v1195_v39  ;;  %v1534_v48 = vpack.c.bf16 %v220_v43, %v218_v42  ;;  %v217_v49 = vld [vmem:[%s2253_s3 + $0x120] sm:$0xff] }
  0x72   : > { %1585 = vmatpush1.bf16.msra.mxu1 %v1584_v11  ;;  %1523 = vmatprep.subr.bf16.mxu0 %v1522_v12  ;;  %v219_v50 = vld [vmem:[%s2253_s3 + $0x130] sm:$0xff]  ;;  %v1199_v51 = vld [vmem:[%s2253_s3 + $0x320] sm:$0xff]  ;;  %v1598_v52 = vpack.c.bf16 %v1202_v45, %v1200_v44  ;;  %v222_v54 = vld [vmem:[%s2253_s3 + $0x148] sm:$0xff] }
  0x73   : > { %1587 = vmatprep.subr.bf16.mxu1 %v1586_v16  ;;  %v1201_v53 = vld [vmem:[%s2253_s3 + $0x330] sm:$0xff]  ;;  %v224_v55 = vld [vmem:[%s2253_s3 + $0x158] sm:$0xff]  ;;  %v1204_v56 = vld [vmem:[%s2253_s3 + $0x348] sm:$0xff]  ;;  %v1536_v58 = vpack.c.bf16 %v219_v50, %v217_v49 }
  0x74   : > { %v1206_v57 = vld [vmem:[%s2253_s3 + $0x358] sm:$0xff]  ;;  %v1600_v59 = vpack.c.bf16 %v1201_v53, %v1199_v51  ;;  %v1538_v60 = vpack.c.bf16 %v224_v55, %v222_v54  ;;  %v221_v61 = vld [vmem:[%s2253_s3 + $0x140] sm:$0xff]  ;;  %v223_v62 = vld [vmem:[%s2253_s3 + $0x150] sm:$0xff] }
  0x75   : > { %1525 = vmatpush1.bf16.msra.mxu0 %v1524_v22  ;;  %v1203_v63 = vld [vmem:[%s2253_s3 + $0x340] sm:$0xff]  ;;  %v1602_v0 = vpack.c.bf16 %v1206_v57, %v1204_v56  ;;  %v1205_v1 = vld [vmem:[%s2253_s3 + $0x350] sm:$0xff]  ;;  %v226_v2 = vld [vmem:[%s2253_s3 + $0x168] sm:$0xff]  ;;  %v1540_v6 = vpack.c.bf16 %v223_v62, %v221_v61 }
  0x76   : > { %1589 = vmatpush1.bf16.msra.mxu1 %v1588_v23  ;;  %1527 = vmatprep.subr.bf16.mxu0 %v1526_v24  ;;  %v228_v3 = vld [vmem:[%s2253_s3 + $0x178] sm:$0xff]  ;;  %v1208_v4 = vld [vmem:[%s2253_s3 + $0x368] sm:$0xff]  ;;  %v225_v7 = vld [vmem:[%s2253_s3 + $0x160] sm:$0xff]  ;;  %v1604_v8 = vpack.c.bf16 %v1205_v1, %v1203_v63 }
  0x77   : > { %1591 = vmatprep.subr.bf16.mxu1 %v1590_v28  ;;  %v1210_v5 = vld [vmem:[%s2253_s3 + $0x378] sm:$0xff]  ;;  %v1542_v9 = vpack.c.bf16 %v228_v3, %v226_v2  ;;  %v227_v10 = vld [vmem:[%s2253_s3 + $0x170] sm:$0xff]  ;;  %v1207_v11 = vld [vmem:[%s2253_s3 + $0x360] sm:$0xff] }
  0x78   : > { %v1209_v12 = vld [vmem:[%s2253_s3 + $0x370] sm:$0xff]  ;;  %v1606_v13 = vpack.c.bf16 %v1210_v5, %v1208_v4  ;;  %v230_v14 = vld [vmem:[%s2253_s3 + $0x188] sm:$0xff]  ;;  %v232_v15 = vld [vmem:[%s2253_s3 + $0x198] sm:$0xff]  ;;  %v1544_v21 = vpack.c.bf16 %v227_v10, %v225_v7 }
  0x79   : > { %1529 = vmatpush1.bf16.msra.mxu0 %v1528_v34  ;;  %v2357_v16 = vld [vmem:[#allocation2] sm:$0xff]  ;;  %v1212_v17 = vld [vmem:[%s2253_s3 + $0x388] sm:$0xff]  ;;  %v1214_v18 = vld [vmem:[%s2253_s3 + $0x398] sm:$0xff]  ;;  %v1608_v23 = vpack.c.bf16 %v1209_v12, %v1207_v11  ;;  %v1546_v24 = vpack.c.bf16 %v232_v15, %v230_v14 }
  0x7a   : > { %1593 = vmatpush1.bf16.msra.mxu1 %v1592_v35  ;;  %1531 = vmatprep.subr.bf16.mxu0 %v1530_v36  ;;  %v2363_v19 = vcombine.high %v2357_v16, %v2357_v16  ;;  %v2365_v20 = vld [vmem:[#allocation2 + $0x8] sm:$0xff]  ;;  %v229_v25 = vld [vmem:[%s2253_s3 + $0x180] sm:$0xff]  ;;  %v231_v26 = vld [vmem:[%s2253_s3 + $0x190] sm:$0xff]  ;;  %v1610_v28 = vpack.c.bf16 %v1214_v18, %v1212_v17 }
  0x7b   : > { %1595 = vmatprep.subr.bf16.mxu1 %v1594_v40  ;;  %v2369_v22 = vcombine.high %v2365_v20, %v2365_v20  ;;  %v1211_v27 = vld [vmem:[%s2253_s3 + $0x380] sm:$0xff]  ;;  %v1213_v29 = vld [vmem:[%s2253_s3 + $0x390] sm:$0xff]  ;;  %v234_v30 = vld [vmem:[%s2253_s3 + $0x1a8] sm:$0xff]  ;;  %v1548_v34 = vpack.c.bf16 %v231_v26, %v229_v25 }
  0x7c   : > { %v236_v31 = vld [vmem:[%s2253_s3 + $0x1b8] sm:$0xff]  ;;  %312 = vmatprep.mubr.f32.mxu0 %v2363_v19  ;;  %v1216_v32 = vld [vmem:[%s2253_s3 + $0x3a8] sm:$0xff]  ;;  %v1612_v35 = vpack.c.bf16 %v1213_v29, %v1211_v27  ;;  %v233_v37 = vld [vmem:[%s2253_s3 + $0x1a0] sm:$0xff] }
  0x7d   : > { %1533 = vmatpush1.bf16.msra.mxu0 %v1532_v46  ;;  %v1218_v33 = vld [vmem:[%s2253_s3 + $0x3b8] sm:$0xff]  ;;  %458 = vmatprep.mubr.f32.mxu1 %v2369_v22  ;;  %v1550_v36 = vpack.c.bf16 %v236_v31, %v234_v30  ;;  %v235_v38 = vld [vmem:[%s2253_s3 + $0x1b0] sm:$0xff]  ;;  %v1215_v39 = vld [vmem:[%s2253_s3 + $0x3a0] sm:$0xff] }
  0x7e   : > { %1597 = vmatpush1.bf16.msra.mxu1 %v1596_v47  ;;  %1535 = vmatprep.subr.bf16.mxu0 %v1534_v48  ;;  %v1614_v40 = vpack.c.bf16 %v1218_v33, %v1216_v32  ;;  %v1217_v41 = vld [vmem:[%s2253_s3 + $0x3b0] sm:$0xff]  ;;  %v238_v42 = vld [vmem:[%s2253_s3 + $0x1c8] sm:$0xff]  ;;  %v240_v43 = vld [vmem:[%s2253_s3 + $0x1d8] sm:$0xff]  ;;  %v1552_v46 = vpack.c.bf16 %v235_v38, %v233_v37 }
  0x7f   : > { %1599 = vmatprep.subr.bf16.mxu1 %v1598_v52  ;;  %v1220_v44 = vld [vmem:[%s2253_s3 + $0x3c8] sm:$0xff]  ;;  %v1222_v45 = vld [vmem:[%s2253_s3 + $0x3d8] sm:$0xff]  ;;  %v1616_v47 = vpack.c.bf16 %v1217_v41, %v1215_v39  ;;  %v1554_v48 = vpack.c.bf16 %v240_v43, %v238_v42  ;;  %v237_v49 = vld [vmem:[%s2253_s3 + $0x1c0] sm:$0xff] }
  0x80   : > { %v239_v50 = vld [vmem:[%s2253_s3 + $0x1d0] sm:$0xff]  ;;  %v1219_v51 = vld [vmem:[%s2253_s3 + $0x3c0] sm:$0xff]  ;;  %v1618_v52 = vpack.c.bf16 %v1222_v45, %v1220_v44  ;;  %v242_v54 = vld [vmem:[%s2253_s3 + $0x1e8] sm:$0xff] }
  0x81   : > { %1537 = vmatpush1.bf16.msra.mxu0 %v1536_v58  ;;  %v1221_v53 = vld [vmem:[%s2253_s3 + $0x3d0] sm:$0xff]  ;;  %v244_v55 = vld [vmem:[%s2253_s3 + $0x1f8] sm:$0xff]  ;;  %v1224_v56 = vld [vmem:[%s2253_s3 + $0x3e8] sm:$0xff]  ;;  %v1556_v58 = vpack.c.bf16 %v239_v50, %v237_v49 }
  0x82   : > { %1601 = vmatpush1.bf16.msra.mxu1 %v1600_v59  ;;  %1539 = vmatprep.subr.bf16.mxu0 %v1538_v60  ;;  %v1226_v57 = vld [vmem:[%s2253_s3 + $0x3f8] sm:$0xff]  ;;  %v1620_v59 = vpack.c.bf16 %v1221_v53, %v1219_v51  ;;  %v1558_v60 = vpack.c.bf16 %v244_v55, %v242_v54  ;;  %v241_v61 = vld [vmem:[%s2253_s3 + $0x1e0] sm:$0xff]  ;;  %v243_v62 = vld [vmem:[%s2253_s3 + $0x1f0] sm:$0xff] }
  0x83   : > { %1603 = vmatprep.subr.bf16.mxu1 %v1602_v0  ;;  %v1223_v63 = vld [vmem:[%s2253_s3 + $0x3e0] sm:$0xff]  ;;  %v1622_v0 = vpack.c.bf16 %v1226_v57, %v1224_v56  ;;  %v1225_v1 = vld [vmem:[%s2253_s3 + $0x3f0] sm:$0xff]  ;;  %v1229_v2 = vld [vmem:[%s2253_s3 + $0x408] sm:$0xff] }
  0x84   : > { %v1231_v3 = vld [vmem:[%s2253_s3 + $0x418] sm:$0xff]  ;;  %v1294_v4 = vld [vmem:[%s2253_s3 + $0x608] sm:$0xff]  ;;  %v1624_v7 = vpack.c.bf16 %v1225_v1, %v1223_v63  ;;  %v1230_v10 = vld [vmem:[%s2253_s3 + $0x410] sm:$0xff] }
  0x85   : > { %1541 = vmatpush1.bf16.msra.mxu0 %v1540_v6  ;;  %v1296_v5 = vld [vmem:[%s2253_s3 + $0x618] sm:$0xff]  ;;  %v1560_v6 = vpack.c.bf16 %v243_v62, %v241_v61  ;;  %v1293_v11 = vld [vmem:[%s2253_s3 + $0x600] sm:$0xff]  ;;  %v1233_v14 = vld [vmem:[%s2253_s3 + $0x428] sm:$0xff] }
  0x86   : > { %1605 = vmatpush1.bf16.msra.mxu1 %v1604_v8  ;;  %1543 = vmatprep.subr.bf16.mxu0 %v1542_v9  ;;  %v1626_v8 = vpack.c.bf16 %v1231_v3, %v1229_v2  ;;  %v1228_v9 = vld [vmem:[%s2253_s3 + $0x400] sm:$0xff]  ;;  %v1690_v12 = vpack.c.bf16 %v1296_v5, %v1294_v4  ;;  %v1235_v15 = vld [vmem:[%s2253_s3 + $0x438] sm:$0xff]  ;;  %v1298_v17 = vld [vmem:[%s2253_s3 + $0x628] sm:$0xff] }
  0x87   : > { %1607 = vmatprep.subr.bf16.mxu1 %v1606_v13  ;;  %v1295_v13 = vld [vmem:[%s2253_s3 + $0x610] sm:$0xff]  ;;  %v1300_v18 = vld [vmem:[%s2253_s3 + $0x638] sm:$0xff]  ;;  %v1232_v25 = vld [vmem:[%s2253_s3 + $0x420] sm:$0xff] }
  0x88   : > { %v1234_v26 = vld [vmem:[%s2253_s3 + $0x430] sm:$0xff]  ;;  %v1297_v27 = vld [vmem:[%s2253_s3 + $0x620] sm:$0xff]  ;;  %v1237_v30 = vld [vmem:[%s2253_s3 + $0x448] sm:$0xff] }
  0x89   : > { %1545 = vmatpush1.bf16.msra.mxu0 %v1544_v21  ;;  %v1628_v21 = vpack.c.bf16 %v1230_v10, %v1228_v9  ;;  %v1299_v29 = vld [vmem:[%s2253_s3 + $0x630] sm:$0xff]  ;;  %v1239_v31 = vld [vmem:[%s2253_s3 + $0x458] sm:$0xff]  ;;  %v1302_v32 = vld [vmem:[%s2253_s3 + $0x648] sm:$0xff] }
  0x8a   : > { %1609 = vmatpush1.bf16.msra.mxu1 %v1608_v23  ;;  %1547 = vmatprep.subr.bf16.mxu0 %v1546_v24  ;;  %v1692_v23 = vpack.c.bf16 %v1295_v13, %v1293_v11  ;;  %v1630_v24 = vpack.c.bf16 %v1235_v15, %v1233_v14  ;;  %v1304_v33 = vld [vmem:[%s2253_s3 + $0x658] sm:$0xff]  ;;  %v1236_v37 = vld [vmem:[%s2253_s3 + $0x440] sm:$0xff]  ;;  %v1238_v38 = vld [vmem:[%s2253_s3 + $0x450] sm:$0xff] }
  0x8b   : > { %1611 = vmatprep.subr.bf16.mxu1 %v1610_v28  ;;  %v1694_v28 = vpack.c.bf16 %v1300_v18, %v1298_v17  ;;  %v1301_v39 = vld [vmem:[%s2253_s3 + $0x640] sm:$0xff]  ;;  %v1303_v41 = vld [vmem:[%s2253_s3 + $0x650] sm:$0xff]  ;;  %v1241_v42 = vld [vmem:[%s2253_s3 + $0x468] sm:$0xff] }
  0x8c   : > { %v1243_v43 = vld [vmem:[%s2253_s3 + $0x478] sm:$0xff]  ;;  %v1306_v44 = vld [vmem:[%s2253_s3 + $0x668] sm:$0xff]  ;;  %v1240_v49 = vld [vmem:[%s2253_s3 + $0x460] sm:$0xff] }
  0x8d   : > { %1549 = vmatpush1.bf16.msra.mxu0 %v1548_v34  ;;  %v1632_v34 = vpack.c.bf16 %v1234_v26, %v1232_v25  ;;  %v1308_v45 = vld [vmem:[%s2253_s3 + $0x678] sm:$0xff]  ;;  %v1242_v50 = vld [vmem:[%s2253_s3 + $0x470] sm:$0xff]  ;;  %v1305_v51 = vld [vmem:[%s2253_s3 + $0x660] sm:$0xff] }
  0x8e   : > { %1613 = vmatpush1.bf16.msra.mxu1 %v1612_v35  ;;  %1551 = vmatprep.subr.bf16.mxu0 %v1550_v36  ;;  %v1696_v35 = vpack.c.bf16 %v1299_v29, %v1297_v27  ;;  %v1634_v36 = vpack.c.bf16 %v1239_v31, %v1237_v30  ;;  %v1245_v53 = vld [vmem:[%s2253_s3 + $0x488] sm:$0xff]  ;;  %v1312_v55 = vld [vmem:[%s2253_s3 + $0x698] sm:$0xff]  ;;  %v1640_v56 = vpack.c.bf16 %v1242_v50, %v1240_v49  ;;  %v1309_v61 = vld [vmem:[%s2253_s3 + $0x680] sm:$0xff] }
  0x8f   : > { %1615 = vmatprep.subr.bf16.mxu1 %v1614_v40  ;;  %v1698_v40 = vpack.c.bf16 %v1304_v33, %v1302_v32  ;;  %v1310_v54 = vld [vmem:[%s2253_s3 + $0x688] sm:$0xff]  ;;  %v1311_v63 = vld [vmem:[%s2253_s3 + $0x690] sm:$0xff]  ;;  %v1251_v1 = vld [vmem:[%s2253_s3 + $0x4b8] sm:$0xff] }
  0x90   : > { %v1706_v62 = vpack.c.bf16 %v1312_v55, %v1310_v54  ;;  %v1314_v2 = vld [vmem:[%s2253_s3 + $0x6a8] sm:$0xff]  ;;  %v1316_v3 = vld [vmem:[%s2253_s3 + $0x6b8] sm:$0xff]  ;;  %v1708_v5 = vpack.c.bf16 %v1311_v63, %v1309_v61  ;;  %v1313_v9 = vld [vmem:[%s2253_s3 + $0x6a0] sm:$0xff] }
  0x91   : > { %1553 = vmatpush1.bf16.msra.mxu0 %v1552_v46  ;;  %v1636_v46 = vpack.c.bf16 %v1238_v38, %v1236_v37  ;;  %v1710_v10 = vpack.c.bf16 %v1316_v3, %v1314_v2  ;;  %v1315_v11 = vld [vmem:[%s2253_s3 + $0x6b0] sm:$0xff]  ;;  %v1255_v13 = vld [vmem:[%s2253_s3 + $0x4d8] sm:$0xff]  ;;  %v1318_v14 = vld [vmem:[%s2253_s3 + $0x6c8] sm:$0xff] }
  0x92   : > { %1617 = vmatpush1.bf16.msra.mxu1 %v1616_v47  ;;  %1555 = vmatprep.subr.bf16.mxu0 %v1554_v48  ;;  %v1700_v47 = vpack.c.bf16 %v1303_v41, %v1301_v39  ;;  %v1638_v48 = vpack.c.bf16 %v1243_v43, %v1241_v42  ;;  %v1320_v15 = vld [vmem:[%s2253_s3 + $0x6d8] sm:$0xff]  ;;  %v1712_v18 = vpack.c.bf16 %v1315_v11, %v1313_v9  ;;  %v1317_v25 = vld [vmem:[%s2253_s3 + $0x6c0] sm:$0xff]  ;;  %v1319_v27 = vld [vmem:[%s2253_s3 + $0x6d0] sm:$0xff] }
  0x93   : > { %1619 = vmatprep.subr.bf16.mxu1 %v1618_v52  ;;  %v1307_v52 = vld [vmem:[%s2253_s3 + $0x670] sm:$0xff]  ;;  %v1714_v26 = vpack.c.bf16 %v1320_v15, %v1318_v14  ;;  %v1259_v29 = vld [vmem:[%s2253_s3 + $0x4f8] sm:$0xff]  ;;  %v1322_v30 = vld [vmem:[%s2253_s3 + $0x6e8] sm:$0xff]  ;;  %v1716_v33 = vpack.c.bf16 %v1319_v27, %v1317_v25 }
  0x94   : > { %v1704_v57 = vpack.c.bf16 %v1307_v52, %v1305_v51  ;;  %v1324_v31 = vld [vmem:[%s2253_s3 + $0x6f8] sm:$0xff]  ;;  %v1321_v37 = vld [vmem:[%s2253_s3 + $0x6e0] sm:$0xff]  ;;  %v1323_v39 = vld [vmem:[%s2253_s3 + $0x6f0] sm:$0xff] }
  0x95   : > { %1557 = vmatpush1.bf16.msra.mxu0 %v1556_v58  ;;  %v1718_v38 = vpack.c.bf16 %v1324_v31, %v1322_v30  ;;  %v1263_v41 = vld [vmem:[%s2253_s3 + $0x518] sm:$0xff]  ;;  %v1326_v42 = vld [vmem:[%s2253_s3 + $0x708] sm:$0xff]  ;;  %v1325_v49 = vld [vmem:[%s2253_s3 + $0x700] sm:$0xff] }
  0x96   : > { %1621 = vmatpush1.bf16.msra.mxu1 %v1620_v59  ;;  %1559 = vmatprep.subr.bf16.mxu0 %v1558_v60  ;;  %v1244_v59 = vld [vmem:[%s2253_s3 + $0x480] sm:$0xff]  ;;  %v1246_v60 = vld [vmem:[%s2253_s3 + $0x490] sm:$0xff]  ;;  %v1328_v43 = vld [vmem:[%s2253_s3 + $0x718] sm:$0xff] }
  0x97   : > { %1623 = vmatprep.subr.bf16.mxu1 %v1622_v0  ;;  %v1249_v0 = vld [vmem:[%s2253_s3 + $0x4a8] sm:$0xff]  ;;  %v1644_v4 = vpack.c.bf16 %v1246_v60, %v1244_v59  ;;  %v1722_v50 = vpack.c.bf16 %v1328_v43, %v1326_v42  ;;  %v1327_v51 = vld [vmem:[%s2253_s3 + $0x710] sm:$0xff]  ;;  %v1267_v52 = vld [vmem:[%s2253_s3 + $0x538] sm:$0xff] }
  0x98   : > { %v1724_v55 = vpack.c.bf16 %v1327_v51, %v1325_v49  ;;  %v1329_v59 = vld [vmem:[%s2253_s3 + $0x720] sm:$0xff]  ;;  %v1331_v61 = vld [vmem:[%s2253_s3 + $0x730] sm:$0xff]  ;;  %v1271_v63 = vld [vmem:[%s2253_s3 + $0x558] sm:$0xff] }
  0x99   : > { %1561 = vmatpush1.bf16.msra.mxu0 %v1560_v6  ;;  %v1646_v6 = vpack.c.bf16 %v1251_v1, %v1249_v0  ;;  %v1334_v0 = vld [vmem:[%s2253_s3 + $0x748] sm:$0xff]  ;;  %v1336_v1 = vld [vmem:[%s2253_s3 + $0x758] sm:$0xff]  ;;  %v1728_v3 = vpack.c.bf16 %v1331_v61, %v1329_v59  ;;  %v1335_v9 = vld [vmem:[%s2253_s3 + $0x750] sm:$0xff] }
  0x9a   : > { %1625 = vmatpush1.bf16.msra.mxu1 %v1624_v7  ;;  %1627 = vmatprep.subr.bf16.mxu0 %v1626_v8  ;;  %v1248_v7 = vld [vmem:[%s2253_s3 + $0x4a0] sm:$0xff]  ;;  %v1250_v8 = vld [vmem:[%s2253_s3 + $0x4b0] sm:$0xff]  ;;  %v1275_v11 = vld [vmem:[%s2253_s3 + $0x578] sm:$0xff] }
  0x9b   : > { %1691 = vmatprep.subr.bf16.mxu1 %v1690_v12  ;;  %v1253_v12 = vld [vmem:[%s2253_s3 + $0x4c8] sm:$0xff]  ;;  %v1648_v17 = vpack.c.bf16 %v1250_v8, %v1248_v7  ;;  %v1333_v7 = vld [vmem:[%s2253_s3 + $0x740] sm:$0xff]  ;;  %v1730_v8 = vpack.c.bf16 %v1336_v1, %v1334_v0  ;;  %v1339_v25 = vld [vmem:[%s2253_s3 + $0x770] sm:$0xff] }
  0x9c   : > { %313 = vmatmul.mubr.f32.vlgmr.msra.gmra.mrb[0].mxu0 %v2357_v16  ;;  %v1732_v15 = vpack.c.bf16 %v1335_v9, %v1333_v7  ;;  %v1279_v27 = vld [vmem:[%s2253_s3 + $0x598] sm:$0xff]  ;;  %v1347_v49 = vld [vmem:[%s2253_s3 + $0x7b0] sm:$0xff] }
  0x9d   : > { %459 = vmatmul.mubr.f32.vlgmr.msra.gmra.mrb[0].mxu1 %v2365_v20  ;;  %1629 = vmatpush1.bf16.msra.mxu0 %v1628_v21  ;;  %v1650_v21 = vpack.c.bf16 %v1255_v13, %v1253_v12  ;;  %v1338_v12 = vld [vmem:[%s2253_s3 + $0x768] sm:$0xff]  ;;  %v1340_v13 = vld [vmem:[%s2253_s3 + $0x778] sm:$0xff]  ;;  %v1351_v59 = vld [vmem:[%s2253_s3 + $0x7d0] sm:$0xff] }
  0x9e   : > { %1693 = vmatpush1.bf16.msra.mxu1 %v1692_v23  ;;  %1631 = vmatprep.subr.bf16.mxu0 %v1630_v24  ;;  %v1252_v23 = vld [vmem:[%s2253_s3 + $0x4c0] sm:$0xff]  ;;  %v1254_v24 = vld [vmem:[%s2253_s3 + $0x4d0] sm:$0xff]  ;;  %v1287_v51 = vld [vmem:[%s2253_s3 + $0x5d8] sm:$0xff] }
  0x9f   : > { %1695 = vmatprep.subr.bf16.mxu1 %v1694_v28  ;;  %604 = vmatprep.mubr.f32.mxu0 %v2363_v19  ;;  %v1702_v19 = vpack.c.bf16 %v1308_v45, %v1306_v44  ;;  %v1257_v28 = vld [vmem:[%s2253_s3 + $0x4e8] sm:$0xff]  ;;  %v1652_v32 = vpack.c.bf16 %v1254_v24, %v1252_v23  ;;  %v1720_v45 = vpack.c.bf16 %v1323_v39, %v1321_v37  ;;  %v1337_v23 = vld [vmem:[%s2253_s3 + $0x760] sm:$0xff]  ;;  %v1343_v37 = vld [vmem:[%s2253_s3 + $0x790] sm:$0xff] }
  0xa0   : > { %750 = vmatprep.mubr.f32.mxu1 %v2369_v22  ;;  %v1247_v22 = vld [vmem:[%s2253_s3 + $0x498] sm:$0xff]  ;;  %v1734_v24 = vpack.c.bf16 %v1340_v13, %v1338_v12  ;;  %v1736_v31 = vpack.c.bf16 %v1339_v25, %v1337_v23  ;;  %v1355_v7 = vld [vmem:[%s2253_s3 + $0x7f0] sm:$0xff] }
  0xa1   : > { %1633 = vmatpush1.bf16.msra.mxu0 %v1632_v34  ;;  %v1642_v58 = vpack.c.bf16 %v1247_v22, %v1245_v53  ;;  %v1654_v34 = vpack.c.bf16 %v1259_v29, %v1257_v28  ;;  %v1330_v53 = vld [vmem:[%s2253_s3 + $0x728] sm:$0xff]  ;;  %v1332_v22 = vld [vmem:[%s2253_s3 + $0x738] sm:$0xff]  ;;  %v1425_v23 = vld [vmem:[%s2253_s3 + $0xa10] sm:$0xff] }
  0xa2   : > { %1697 = vmatpush1.bf16.msra.mxu1 %v1696_v35  ;;  %1635 = vmatprep.subr.bf16.mxu0 %v1634_v36  ;;  %v1256_v35 = vld [vmem:[%s2253_s3 + $0x4e0] sm:$0xff]  ;;  %v1258_v36 = vld [vmem:[%s2253_s3 + $0x4f0] sm:$0xff]  ;;  %v1726_v60 = vpack.c.bf16 %v1332_v22, %v1330_v53  ;;  %v1342_v28 = vld [vmem:[%s2253_s3 + $0x788] sm:$0xff] }
  0xa3   : > { %1699 = vmatprep.subr.bf16.mxu1 %v1698_v40  ;;  %v1261_v40 = vld [vmem:[%s2253_s3 + $0x508] sm:$0xff]  ;;  %v1656_v44 = vpack.c.bf16 %v1258_v36, %v1256_v35  ;;  %v1344_v29 = vld [vmem:[%s2253_s3 + $0x798] sm:$0xff]  ;;  %v1341_v35 = vld [vmem:[%s2253_s3 + $0x780] sm:$0xff] }
  0xa4   : > { %v1738_v36 = vpack.c.bf16 %v1344_v29, %v1342_v28  ;;  %v1283_v39 = vld [vmem:[%s2253_s3 + $0x5b8] sm:$0xff]  ;;  %v1740_v43 = vpack.c.bf16 %v1343_v37, %v1341_v35  ;;  %v1362_v29 = vld [vmem:[%s2253_s3 + $0x820] sm:$0xff]  ;;  %v1429_v37 = vld [vmem:[%s2253_s3 + $0xa30] sm:$0xff] }
  0xa5   : > { %1637 = vmatpush1.bf16.msra.mxu0 %v1636_v46  ;;  %v1658_v46 = vpack.c.bf16 %v1263_v41, %v1261_v40  ;;  %v1346_v40 = vld [vmem:[%s2253_s3 + $0x7a8] sm:$0xff]  ;;  %v1348_v41 = vld [vmem:[%s2253_s3 + $0x7b8] sm:$0xff] }
  0xa6   : > { %1701 = vmatpush1.bf16.msra.mxu1 %v1700_v47  ;;  %1639 = vmatprep.subr.bf16.mxu0 %v1638_v48  ;;  %v1260_v47 = vld [vmem:[%s2253_s3 + $0x500] sm:$0xff]  ;;  %v1262_v48 = vld [vmem:[%s2253_s3 + $0x510] sm:$0xff]  ;;  %v1291_v61 = vld [vmem:[%s2253_s3 + $0x5f8] sm:$0xff] }
  0xa7   : > { %1703 = vmatprep.subr.bf16.mxu1 %v1702_v19  ;;  %v1265_v19 = vld [vmem:[%s2253_s3 + $0x528] sm:$0xff]  ;;  %v1660_v54 = vpack.c.bf16 %v1262_v48, %v1260_v47  ;;  %v1345_v47 = vld [vmem:[%s2253_s3 + $0x7a0] sm:$0xff]  ;;  %v1742_v48 = vpack.c.bf16 %v1348_v41, %v1346_v40  ;;  %v1361_v9 = vld [vmem:[%s2253_s3 + $0x818] sm:$0xff] }
  0xa8   : > { %v1744_v22 = vpack.c.bf16 %v1347_v49, %v1345_v47  ;;  %v1365_v25 = vld [vmem:[%s2253_s3 + $0x838] sm:$0xff]  ;;  %v1432_v41 = vld [vmem:[%s2253_s3 + $0xa48] sm:$0xff]  ;;  %v1366_v47 = vld [vmem:[%s2253_s3 + $0x840] sm:$0xff] }
  0xa9   : > { %1641 = vmatpush1.bf16.msra.mxu0 %v1640_v56  ;;  %v1662_v56 = vpack.c.bf16 %v1267_v52, %v1265_v19  ;;  %v1350_v19 = vld [vmem:[%s2253_s3 + $0x7c8] sm:$0xff]  ;;  %v1352_v52 = vld [vmem:[%s2253_s3 + $0x7d8] sm:$0xff] }
  0xaa   : > { %1705 = vmatpush1.bf16.msra.mxu1 %v1704_v57  ;;  %1643 = vmatprep.subr.bf16.mxu0 %v1642_v58  ;;  %v1264_v57 = vld [vmem:[%s2253_s3 + $0x520] sm:$0xff]  ;;  %v1266_v58 = vld [vmem:[%s2253_s3 + $0x530] sm:$0xff]  ;;  %v2550_v35 = vld [vmem:[#allocation2 + $0x8] sm:$0xff] }
  0xab   : > { %1707 = vmatprep.subr.bf16.mxu1 %v1706_v62  ;;  %v1269_v62 = vld [vmem:[%s2253_s3 + $0x548] sm:$0xff]  ;;  %v1664_v2 = vpack.c.bf16 %v1266_v58, %v1264_v57  ;;  %v1349_v57 = vld [vmem:[%s2253_s3 + $0x7c0] sm:$0xff]  ;;  %v1746_v58 = vpack.c.bf16 %v1352_v52, %v1350_v19  ;;  %v1373_v19 = vld [vmem:[%s2253_s3 + $0x878] sm:$0xff] }
  0xac   : > { %v1748_v1 = vpack.c.bf16 %v1351_v59, %v1349_v57  ;;  %v1438_v52 = vld [vmem:[%s2253_s3 + $0xa78] sm:$0xff]  ;;  %v1435_v57 = vld [vmem:[%s2253_s3 + $0xa60] sm:$0xff]  ;;  %v1437_v59 = vld [vmem:[%s2253_s3 + $0xa70] sm:$0xff] }
  0xad   : > { %1645 = vmatpush1.bf16.msra.mxu0 %v1644_v4  ;;  %v1666_v4 = vpack.c.bf16 %v1271_v63, %v1269_v62  ;;  %v1354_v62 = vld [vmem:[%s2253_s3 + $0x7e8] sm:$0xff]  ;;  %v1356_v63 = vld [vmem:[%s2253_s3 + $0x7f8] sm:$0xff] }
  0xae   : > { %1709 = vmatpush1.bf16.msra.mxu1 %v1708_v5  ;;  %1647 = vmatprep.subr.bf16.mxu0 %v1646_v6  ;;  %v1268_v5 = vld [vmem:[%s2253_s3 + $0x540] sm:$0xff]  ;;  %v1270_v6 = vld [vmem:[%s2253_s3 + $0x550] sm:$0xff] }
  0xaf   : > { %1711 = vmatprep.subr.bf16.mxu1 %v1710_v10  ;;  %v1273_v10 = vld [vmem:[%s2253_s3 + $0x568] sm:$0xff]  ;;  %v1668_v14 = vpack.c.bf16 %v1270_v6, %v1268_v5  ;;  %v1353_v5 = vld [vmem:[%s2253_s3 + $0x7e0] sm:$0xff]  ;;  %v1750_v6 = vpack.c.bf16 %v1356_v63, %v1354_v62  ;;  %v1442_v63 = vld [vmem:[%s2253_s3 + $0xa98] sm:$0xff] }
  0xb0   : > { %v1752_v13 = vpack.c.bf16 %v1355_v7, %v1353_v5  ;;  %v1440_v62 = vld [vmem:[%s2253_s3 + $0xa88] sm:$0xff]  ;;  %v1439_v5 = vld [vmem:[%s2253_s3 + $0xa80] sm:$0xff]  ;;  %v1441_v7 = vld [vmem:[%s2253_s3 + $0xa90] sm:$0xff] }
  0xb1   : > { %1649 = vmatpush1.bf16.msra.mxu0 %v1648_v17  ;;  %v1670_v17 = vpack.c.bf16 %v1275_v11, %v1273_v10  ;;  %v1424_v10 = vld [vmem:[%s2253_s3 + $0xa08] sm:$0xff]  ;;  %v1426_v11 = vld [vmem:[%s2253_s3 + $0xa18] sm:$0xff] }
  0xb2   : > { %1713 = vmatpush1.bf16.msra.mxu1 %v1712_v18  ;;  %1651 = vmatprep.subr.bf16.mxu0 %v1650_v21  ;;  %v1272_v18 = vld [vmem:[%s2253_s3 + $0x560] sm:$0xff]  ;;  %v1274_v21 = vld [vmem:[%s2253_s3 + $0x570] sm:$0xff] }
  0xb3   : > { %1715 = vmatprep.subr.bf16.mxu1 %v1714_v26  ;;  %v1277_v26 = vld [vmem:[%s2253_s3 + $0x588] sm:$0xff]  ;;  %v1672_v30 = vpack.c.bf16 %v1274_v21, %v1272_v18  ;;  %v1423_v18 = vld [vmem:[%s2253_s3 + $0xa00] sm:$0xff]  ;;  %v1818_v21 = vpack.c.bf16 %v1426_v11, %v1424_v10  ;;  %v1446_v11 = vld [vmem:[%s2253_s3 + $0xab8] sm:$0xff] }
  0xb4   : > { %v1444_v10 = vld [vmem:[%s2253_s3 + $0xaa8] sm:$0xff] }
  0xb5   : > { %1653 = vmatpush1.bf16.msra.mxu0 %v1652_v32  ;;  %v1674_v32 = vpack.c.bf16 %v1279_v27, %v1277_v26  ;;  %v1428_v26 = vld [vmem:[%s2253_s3 + $0xa28] sm:$0xff]  ;;  %v1430_v27 = vld [vmem:[%s2253_s3 + $0xa38] sm:$0xff] }
  0xb6   : > { %1717 = vmatpush1.bf16.msra.mxu1 %v1716_v33  ;;  %1655 = vmatprep.subr.bf16.mxu0 %v1654_v34  ;;  %v1276_v33 = vld [vmem:[%s2253_s3 + $0x580] sm:$0xff]  ;;  %v1278_v34 = vld [vmem:[%s2253_s3 + $0x590] sm:$0xff] }
  0xb7   : > { %1719 = vmatprep.subr.bf16.mxu1 %v1718_v38  ;;  %v1281_v38 = vld [vmem:[%s2253_s3 + $0x5a8] sm:$0xff]  ;;  %v1676_v42 = vpack.c.bf16 %v1278_v34, %v1276_v33  ;;  %v1364_v33 = vld [vmem:[%s2253_s3 + $0x830] sm:$0xff]  ;;  %v1427_v34 = vld [vmem:[%s2253_s3 + $0xa20] sm:$0xff] }
  0xb9   : > { %1657 = vmatpush1.bf16.msra.mxu0 %v1656_v44  ;;  %v1678_v44 = vpack.c.bf16 %v1283_v39, %v1281_v38  ;;  %v1367_v38 = vld [vmem:[%s2253_s3 + $0x848] sm:$0xff]  ;;  %v1369_v39 = vld [vmem:[%s2253_s3 + $0x858] sm:$0xff] }
  0xba   : > { %1721 = vmatpush1.bf16.msra.mxu1 %v1720_v45  ;;  %1659 = vmatprep.subr.bf16.mxu0 %v1658_v46  ;;  %v1280_v45 = vld [vmem:[%s2253_s3 + $0x5a0] sm:$0xff]  ;;  %v1282_v46 = vld [vmem:[%s2253_s3 + $0x5b0] sm:$0xff] }
  0xbb   : > { %1723 = vmatprep.subr.bf16.mxu1 %v1722_v50  ;;  %v1285_v50 = vld [vmem:[%s2253_s3 + $0x5c8] sm:$0xff]  ;;  %v1680_v53 = vpack.c.bf16 %v1282_v46, %v1280_v45  ;;  %v1824_v45 = vpack.c.bf16 %v1429_v37, %v1427_v34  ;;  %v1762_v46 = vpack.c.bf16 %v1369_v39, %v1367_v38  ;;  %v1447_v34 = vld [vmem:[%s2253_s3 + $0xac0] sm:$0xff]  ;;  %v1449_v37 = vld [vmem:[%s2253_s3 + $0xad0] sm:$0xff] }
  0xbc   : > { %v1387_v38 = vld [vmem:[%s2253_s3 + $0x8e8] sm:$0xff]  ;;  %v1389_v39 = vld [vmem:[%s2253_s3 + $0x8f8] sm:$0xff] }
  0xbd   : > { %1661 = vmatpush1.bf16.msra.mxu0 %v1660_v54  ;;  %v1682_v54 = vpack.c.bf16 %v1287_v51, %v1285_v50  ;;  %v1433_v50 = vld [vmem:[%s2253_s3 + $0xa50] sm:$0xff]  ;;  %v1371_v51 = vld [vmem:[%s2253_s3 + $0x868] sm:$0xff] }
  0xbe   : > { %1725 = vmatpush1.bf16.msra.mxu1 %v1724_v55  ;;  %1663 = vmatprep.subr.bf16.mxu0 %v1662_v56  ;;  %v1284_v55 = vld [vmem:[%s2253_s3 + $0x5c0] sm:$0xff]  ;;  %v1286_v56 = vld [vmem:[%s2253_s3 + $0x5d0] sm:$0xff] }
  0xbf   : > { %1727 = vmatprep.subr.bf16.mxu1 %v1726_v60  ;;  %v1289_v60 = vld [vmem:[%s2253_s3 + $0x5e8] sm:$0xff]  ;;  %v1684_v0 = vpack.c.bf16 %v1286_v56, %v1284_v55  ;;  %v1370_v55 = vld [vmem:[%s2253_s3 + $0x860] sm:$0xff]  ;;  %v1372_v56 = vld [vmem:[%s2253_s3 + $0x870] sm:$0xff] }
  0xc1   : > { %1665 = vmatpush1.bf16.msra.mxu0 %v1664_v2  ;;  %v1686_v2 = vpack.c.bf16 %v1291_v61, %v1289_v60  ;;  %v1375_v60 = vld [vmem:[%s2253_s3 + $0x888] sm:$0xff]  ;;  %v1377_v61 = vld [vmem:[%s2253_s3 + $0x898] sm:$0xff] }
  0xc2   : > { %1729 = vmatpush1.bf16.msra.mxu1 %v1728_v3  ;;  %1667 = vmatprep.subr.bf16.mxu0 %v1666_v4  ;;  %v1288_v3 = vld [vmem:[%s2253_s3 + $0x5e0] sm:$0xff]  ;;  %v1290_v4 = vld [vmem:[%s2253_s3 + $0x5f0] sm:$0xff] }
  0xc3   : > { %1731 = vmatprep.subr.bf16.mxu1 %v1730_v8  ;;  %v1359_v8 = vld [vmem:[%s2253_s3 + $0x808] sm:$0xff]  ;;  %v1688_v12 = vpack.c.bf16 %v1290_v4, %v1288_v3  ;;  %v1374_v3 = vld [vmem:[%s2253_s3 + $0x880] sm:$0xff]  ;;  %v1376_v4 = vld [vmem:[%s2253_s3 + $0x890] sm:$0xff] }
  0xc5   : > { %1669 = vmatpush1.bf16.msra.mxu0 %v1668_v14  ;;  %v1754_v14 = vpack.c.bf16 %v1361_v9, %v1359_v8  ;;  %v1379_v8 = vld [vmem:[%s2253_s3 + $0x8a8] sm:$0xff]  ;;  %v1381_v9 = vld [vmem:[%s2253_s3 + $0x8b8] sm:$0xff] }
  0xc6   : > { %1733 = vmatpush1.bf16.msra.mxu1 %v1732_v15  ;;  %1671 = vmatprep.subr.bf16.mxu0 %v1670_v17  ;;  %v1358_v15 = vld [vmem:[%s2253_s3 + $0x800] sm:$0xff]  ;;  %v1360_v17 = vld [vmem:[%s2253_s3 + $0x810] sm:$0xff] }
  0xc7   : > { %1735 = vmatprep.subr.bf16.mxu1 %v1734_v24  ;;  %v1363_v24 = vld [vmem:[%s2253_s3 + $0x828] sm:$0xff]  ;;  %v1756_v28 = vpack.c.bf16 %v1360_v17, %v1358_v15  ;;  %v1378_v15 = vld [vmem:[%s2253_s3 + $0x8a0] sm:$0xff]  ;;  %v1380_v17 = vld [vmem:[%s2253_s3 + $0x8b0] sm:$0xff] }
  0xc9   : > { %1673 = vmatpush1.bf16.msra.mxu0 %v1672_v30  ;;  %v2546_v30 = vld [vmem:[#allocation2] sm:$0xff] }
  0xca   : > { %1737 = vmatpush1.bf16.msra.mxu1 %v1736_v31  ;;  %1675 = vmatprep.subr.bf16.mxu0 %v1674_v32  ;;  %v1820_v31 = vpack.c.bf16 %v1425_v23, %v1423_v18  ;;  %v1758_v32 = vpack.c.bf16 %v1365_v25, %v1363_v24  ;;  %v830_v40 = vcombine.high %v2546_v30, %v2546_v30  ;;  %v1443_v18 = vld [vmem:[%s2253_s3 + $0xaa0] sm:$0xff]  ;;  %v1445_v23 = vld [vmem:[%s2253_s3 + $0xab0] sm:$0xff]  ;;  %v1383_v24 = vld [vmem:[%s2253_s3 + $0x8c8] sm:$0xff] }
  0xcb   : > { %1739 = vmatprep.subr.bf16.mxu1 %v1738_v36  ;;  %v1822_v36 = vpack.c.bf16 %v1430_v27, %v1428_v26  ;;  %v1385_v25 = vld [vmem:[%s2253_s3 + $0x8d8] sm:$0xff]  ;;  %v1448_v26 = vld [vmem:[%s2253_s3 + $0xac8] sm:$0xff] }
  0xcc   : > { %v1450_v27 = vld [vmem:[%s2253_s3 + $0xad8] sm:$0xff] }
  0xcd   : > { %1677 = vmatpush1.bf16.msra.mxu0 %v1676_v42  ;;  %v1434_v42 = vld [vmem:[%s2253_s3 + $0xa58] sm:$0xff] }
  0xce   : > { %1741 = vmatpush1.bf16.msra.mxu1 %v1740_v43  ;;  %1679 = vmatprep.subr.bf16.mxu0 %v1678_v44  ;;  %v976_v43 = vcombine.high %v2550_v35, %v2550_v35  ;;  %v1760_v44 = vpack.c.bf16 %v1364_v33, %v1362_v29  ;;  %v1826_v49 = vpack.c.bf16 %v1434_v42, %v1432_v41  ;;  %v1384_v33 = vld [vmem:[%s2253_s3 + $0x8d0] sm:$0xff]  ;;  %v1454_v41 = vld [vmem:[%s2253_s3 + $0xaf8] sm:$0xff] }
  0xcf   : > { %1743 = vmatprep.subr.bf16.mxu1 %v1742_v48  ;;  %v1431_v48 = vld [vmem:[%s2253_s3 + $0xa40] sm:$0xff]  ;;  %v1840_v29 = vpack.c.bf16 %v1445_v23, %v1443_v18  ;;  %v1465_v18 = vld [vmem:[%s2253_s3 + $0xb50] sm:$0xff]  ;;  %v1405_v23 = vld [vmem:[%s2253_s3 + $0x978] sm:$0xff] }
  0xd1   : > { %1681 = vmatpush1.bf16.msra.mxu0 %v1680_v53 }
  0xd2   : > { %1745 = vmatpush1.bf16.msra.mxu1 %v1744_v22  ;;  %1683 = vmatprep.subr.bf16.mxu0 %v1682_v54  ;;  %v1828_v22 = vpack.c.bf16 %v1433_v50, %v1431_v48  ;;  %v1766_v54 = vpack.c.bf16 %v1373_v19, %v1371_v51  ;;  %v1453_v48 = vld [vmem:[%s2253_s3 + $0xaf0] sm:$0xff]  ;;  %v1393_v50 = vld [vmem:[%s2253_s3 + $0x918] sm:$0xff]  ;;  %v1456_v51 = vld [vmem:[%s2253_s3 + $0xb08] sm:$0xff] }
  0xd3   : > { %1747 = vmatprep.subr.bf16.mxu1 %v1746_v58  ;;  %v1458_v19 = vld [vmem:[%s2253_s3 + $0xb18] sm:$0xff] }
  0xd5   : > { %1685 = vmatpush1.bf16.msra.mxu0 %v1684_v0  ;;  %v1768_v0 = vpack.c.bf16 %v1372_v56, %v1370_v55  ;;  %v1455_v55 = vld [vmem:[%s2253_s3 + $0xb00] sm:$0xff]  ;;  %v1850_v56 = vpack.c.bf16 %v1458_v19, %v1456_v51 }
  0xd6   : > { %1749 = vmatpush1.bf16.msra.mxu1 %v1748_v1  ;;  %1687 = vmatprep.subr.bf16.mxu0 %v1686_v2  ;;  %v1832_v1 = vpack.c.bf16 %v1437_v59, %v1435_v57  ;;  %v1770_v2 = vpack.c.bf16 %v1377_v61, %v1375_v60  ;;  %v1457_v57 = vld [vmem:[%s2253_s3 + $0xb10] sm:$0xff]  ;;  %v1397_v59 = vld [vmem:[%s2253_s3 + $0x938] sm:$0xff]  ;;  %v1460_v60 = vld [vmem:[%s2253_s3 + $0xb28] sm:$0xff] }
  0xd7   : > { %1751 = vmatprep.subr.bf16.mxu1 %v1750_v6  ;;  %v1834_v6 = vpack.c.bf16 %v1442_v63, %v1440_v62  ;;  %v1462_v61 = vld [vmem:[%s2253_s3 + $0xb38] sm:$0xff]  ;;  %v1852_v63 = vpack.c.bf16 %v1457_v57, %v1455_v55  ;;  %v1477_v55 = vld [vmem:[%s2253_s3 + $0xbb0] sm:$0xff] }
  0xd8   : > { %v1417_v57 = vld [vmem:[%s2253_s3 + $0x9d8] sm:$0xff] }
  0xd9   : > { %1689 = vmatpush1.bf16.msra.mxu0 %v1688_v12  ;;  %v1772_v12 = vpack.c.bf16 %v1376_v4, %v1374_v3  ;;  %v1459_v3 = vld [vmem:[%s2253_s3 + $0xb20] sm:$0xff]  ;;  %v1854_v4 = vpack.c.bf16 %v1462_v61, %v1460_v60 }
  0xda   : > { %1753 = vmatpush1.bf16.msra.mxu1 %v1752_v13  ;;  %1755 = vmatprep.subr.bf16.mxu0 %v1754_v14  ;;  %v1836_v13 = vpack.c.bf16 %v1441_v7, %v1439_v5  ;;  %v1774_v14 = vpack.c.bf16 %v1381_v9, %v1379_v8  ;;  %v1461_v5 = vld [vmem:[%s2253_s3 + $0xb30] sm:$0xff]  ;;  %v1401_v7 = vld [vmem:[%s2253_s3 + $0x958] sm:$0xff]  ;;  %v1464_v8 = vld [vmem:[%s2253_s3 + $0xb48] sm:$0xff] }
  0xdb   : > { %1819 = vmatprep.subr.bf16.mxu1 %v1818_v21  ;;  %v1838_v21 = vpack.c.bf16 %v1446_v11, %v1444_v10  ;;  %v1466_v9 = vld [vmem:[%s2253_s3 + $0xb58] sm:$0xff]  ;;  %v1856_v11 = vpack.c.bf16 %v1461_v5, %v1459_v3  ;;  %v1481_v3 = vld [vmem:[%s2253_s3 + $0xbd0] sm:$0xff] }
  0xdc   : > { %605 = vmatmul.mubr.f32.vlgmr.msra.gmra.mrb[2].mxu0 %v2357_v16  ;;  %v1368_v16 = vld [vmem:[%s2253_s3 + $0x850] sm:$0xff]  ;;  %v1421_v5 = vld [vmem:[%s2253_s3 + $0x9f8] sm:$0xff] }
  0xdd   : > { %751 = vmatmul.mubr.f32.vlgmr.msra.gmra.mrb[2].mxu1 %v2365_v20  ;;  %1757 = vmatpush1.bf16.msra.mxu0 %v1756_v28  ;;  %v1436_v20 = vld [vmem:[%s2253_s3 + $0xa68] sm:$0xff]  ;;  %v1764_v53 = vpack.c.bf16 %v1368_v16, %v1366_v47  ;;  %v1776_v28 = vpack.c.bf16 %v1380_v17, %v1378_v15  ;;  %v1451_v47 = vld [vmem:[%s2253_s3 + $0xae0] sm:$0xff]  ;;  %v1858_v17 = vpack.c.bf16 %v1466_v9, %v1464_v8 }
  0xde   : > { %1821 = vmatpush1.bf16.msra.mxu1 %v1820_v31  ;;  %1759 = vmatprep.subr.bf16.mxu0 %v1758_v32  ;;  %v1830_v58 = vpack.c.bf16 %v1438_v52, %v1436_v20  ;;  %v1778_v31 = vpack.c.bf16 %v1385_v25, %v1383_v24  ;;  %v1382_v32 = vld [vmem:[%s2253_s3 + $0x8c0] sm:$0xff]  ;;  %v1848_v52 = vpack.c.bf16 %v1453_v48, %v1451_v47  ;;  %v1468_v24 = vld [vmem:[%s2253_s3 + $0xb68] sm:$0xff]  ;;  %v1470_v25 = vld [vmem:[%s2253_s3 + $0xb78] sm:$0xff] }
  0xdf   : > { %1823 = vmatprep.subr.bf16.mxu1 %v1822_v36  ;;  %896 = vmatprep.mubr.f32.mxu0 %v830_v40  ;;  %v1842_v36 = vpack.c.bf16 %v1450_v27, %v1448_v26  ;;  %v1452_v40 = vld [vmem:[%s2253_s3 + $0xae8] sm:$0xff]  ;;  %v1780_v42 = vpack.c.bf16 %v1384_v33, %v1382_v32  ;;  %v1463_v15 = vld [vmem:[%s2253_s3 + $0xb40] sm:$0xff]  ;;  %v1862_v33 = vpack.c.bf16 %v1470_v25, %v1468_v24  ;;  %v1473_v47 = vld [vmem:[%s2253_s3 + $0xb90] sm:$0xff] }
  0xe0   : > { %1042 = vmatprep.mubr.f32.mxu1 %v976_v43  ;;  %v1844_v43 = vpack.c.bf16 %v1449_v37, %v1447_v34  ;;  %v1846_v16 = vpack.c.bf16 %v1454_v41, %v1452_v40  ;;  %v1860_v27 = vpack.c.bf16 %v1465_v18, %v1463_v15  ;;  %v1467_v32 = vld [vmem:[%s2253_s3 + $0xb60] sm:$0xff]  ;;  %v1469_v34 = vld [vmem:[%s2253_s3 + $0xb70] sm:$0xff]  ;;  %v1409_v37 = vld [vmem:[%s2253_s3 + $0x998] sm:$0xff] }
  0xe1   : > { %1761 = vmatpush1.bf16.msra.mxu0 %v1760_v44  ;;  %v1782_v44 = vpack.c.bf16 %v1389_v39, %v1387_v38  ;;  %v1472_v38 = vld [vmem:[%s2253_s3 + $0xb88] sm:$0xff]  ;;  %v1474_v39 = vld [vmem:[%s2253_s3 + $0xb98] sm:$0xff]  ;;  %v1864_v41 = vpack.c.bf16 %v1469_v34, %v1467_v32  ;;  %v1485_v15 = vld [vmem:[%s2253_s3 + $0xbf0] sm:$0xff] }
  0xe2   : > { %1825 = vmatpush1.bf16.msra.mxu1 %v1824_v45  ;;  %1763 = vmatprep.subr.bf16.mxu0 %v1762_v46  ;;  %v1386_v45 = vld [vmem:[%s2253_s3 + $0x8e0] sm:$0xff]  ;;  %v1388_v46 = vld [vmem:[%s2253_s3 + $0x8f0] sm:$0xff]  ;;  %v1413_v48 = vld [vmem:[%s2253_s3 + $0x9b8] sm:$0xff] }
  0xe3   : > { %1827 = vmatprep.subr.bf16.mxu1 %v1826_v49  ;;  %v1391_v49 = vld [vmem:[%s2253_s3 + $0x908] sm:$0xff]  ;;  %v1784_v20 = vpack.c.bf16 %v1388_v46, %v1386_v45  ;;  %v1471_v45 = vld [vmem:[%s2253_s3 + $0xb80] sm:$0xff]  ;;  %v1866_v46 = vpack.c.bf16 %v1474_v39, %v1472_v38 }
  0xe4   : > { %v1868_v19 = vpack.c.bf16 %v1473_v47, %v1471_v45 }
  0xe5   : > { %1765 = vmatpush1.bf16.msra.mxu0 %v1764_v53  ;;  %v1786_v53 = vpack.c.bf16 %v1393_v50, %v1391_v49  ;;  %v1476_v49 = vld [vmem:[%s2253_s3 + $0xba8] sm:$0xff]  ;;  %v1478_v50 = vld [vmem:[%s2253_s3 + $0xbb8] sm:$0xff] }
  0xe6   : > { %1829 = vmatpush1.bf16.msra.mxu1 %v1828_v22  ;;  %1767 = vmatprep.subr.bf16.mxu0 %v1766_v54  ;;  %v1390_v22 = vld [vmem:[%s2253_s3 + $0x900] sm:$0xff]  ;;  %v1392_v54 = vld [vmem:[%s2253_s3 + $0x910] sm:$0xff] }
  0xe7   : > { %1831 = vmatprep.subr.bf16.mxu1 %v1830_v58  ;;  %v1395_v58 = vld [vmem:[%s2253_s3 + $0x928] sm:$0xff]  ;;  %v1788_v62 = vpack.c.bf16 %v1392_v54, %v1390_v22  ;;  %v1475_v22 = vld [vmem:[%s2253_s3 + $0xba0] sm:$0xff]  ;;  %v1870_v54 = vpack.c.bf16 %v1478_v50, %v1476_v49 }
  0xe8   : > { %v1872_v61 = vpack.c.bf16 %v1477_v55, %v1475_v22 }
  0xe9   : > { %1769 = vmatpush1.bf16.msra.mxu0 %v1768_v0  ;;  %v1790_v0 = vpack.c.bf16 %v1397_v59, %v1395_v58  ;;  %v1480_v58 = vld [vmem:[%s2253_s3 + $0xbc8] sm:$0xff]  ;;  %v1482_v59 = vld [vmem:[%s2253_s3 + $0xbd8] sm:$0xff] }
  0xea   : > { %1833 = vmatpush1.bf16.msra.mxu1 %v1832_v1  ;;  %1771 = vmatprep.subr.bf16.mxu0 %v1770_v2  ;;  %v1394_v1 = vld [vmem:[%s2253_s3 + $0x920] sm:$0xff]  ;;  %v1396_v2 = vld [vmem:[%s2253_s3 + $0x930] sm:$0xff] }
  0xeb   : > { %1835 = vmatprep.subr.bf16.mxu1 %v1834_v6  ;;  %v1399_v6 = vld [vmem:[%s2253_s3 + $0x948] sm:$0xff]  ;;  %v1792_v10 = vpack.c.bf16 %v1396_v2, %v1394_v1  ;;  %v1479_v1 = vld [vmem:[%s2253_s3 + $0xbc0] sm:$0xff]  ;;  %v1874_v2 = vpack.c.bf16 %v1482_v59, %v1480_v58 }
  0xec   : > { %v1876_v9 = vpack.c.bf16 %v1481_v3, %v1479_v1 }
  0xed   : > { %1773 = vmatpush1.bf16.msra.mxu0 %v1772_v12  ;;  %v1794_v12 = vpack.c.bf16 %v1401_v7, %v1399_v6  ;;  %v1484_v6 = vld [vmem:[%s2253_s3 + $0xbe8] sm:$0xff]  ;;  %v1486_v7 = vld [vmem:[%s2253_s3 + $0xbf8] sm:$0xff] }
  0xee   : > { %1837 = vmatpush1.bf16.msra.mxu1 %v1836_v13  ;;  %1775 = vmatprep.subr.bf16.mxu0 %v1774_v14  ;;  %v1398_v13 = vld [vmem:[%s2253_s3 + $0x940] sm:$0xff]  ;;  %v1400_v14 = vld [vmem:[%s2253_s3 + $0x950] sm:$0xff] }
  0xef   : > { %1839 = vmatprep.subr.bf16.mxu1 %v1838_v21  ;;  %v1403_v21 = vld [vmem:[%s2253_s3 + $0x968] sm:$0xff]  ;;  %v1796_v26 = vpack.c.bf16 %v1400_v14, %v1398_v13  ;;  %v1878_v13 = vpack.c.bf16 %v1486_v7, %v1484_v6  ;;  %v1483_v14 = vld [vmem:[%s2253_s3 + $0xbe0] sm:$0xff] }
  0xf0   : > { %v1880_v18 = vpack.c.bf16 %v1485_v15, %v1483_v14 }
  0xf1   : > { %1777 = vmatpush1.bf16.msra.mxu0 %v1776_v28  ;;  %v1798_v28 = vpack.c.bf16 %v1405_v23, %v1403_v21 }
  0xf2   : > { %1841 = vmatpush1.bf16.msra.mxu1 %v1840_v29  ;;  %1779 = vmatprep.subr.bf16.mxu0 %v1778_v31  ;;  %v1402_v29 = vld [vmem:[%s2253_s3 + $0x960] sm:$0xff]  ;;  %v1404_v31 = vld [vmem:[%s2253_s3 + $0x970] sm:$0xff] }
  0xf3   : > { %1843 = vmatprep.subr.bf16.mxu1 %v1842_v36  ;;  %v1407_v36 = vld [vmem:[%s2253_s3 + $0x988] sm:$0xff]  ;;  %v1800_v40 = vpack.c.bf16 %v1404_v31, %v1402_v29 }
  0xf5   : > { %1781 = vmatpush1.bf16.msra.mxu0 %v1780_v42  ;;  %v1802_v42 = vpack.c.bf16 %v1409_v37, %v1407_v36 }
  0xf6   : > { %1845 = vmatpush1.bf16.msra.mxu1 %v1844_v43  ;;  %1783 = vmatprep.subr.bf16.mxu0 %v1782_v44  ;;  %v1406_v43 = vld [vmem:[%s2253_s3 + $0x980] sm:$0xff]  ;;  %v1408_v44 = vld [vmem:[%s2253_s3 + $0x990] sm:$0xff] }
  0xf7   : > { %1847 = vmatprep.subr.bf16.mxu1 %v1846_v16  ;;  %v1411_v16 = vld [vmem:[%s2253_s3 + $0x9a8] sm:$0xff]  ;;  %v1804_v51 = vpack.c.bf16 %v1408_v44, %v1406_v43 }
  0xf9   : > { %1785 = vmatpush1.bf16.msra.mxu0 %v1784_v20  ;;  %v1806_v20 = vpack.c.bf16 %v1413_v48, %v1411_v16 }
  0xfa   : > { %1849 = vmatpush1.bf16.msra.mxu1 %v1848_v52  ;;  %1787 = vmatprep.subr.bf16.mxu0 %v1786_v53  ;;  %v1410_v52 = vld [vmem:[%s2253_s3 + $0x9a0] sm:$0xff]  ;;  %v1412_v53 = vld [vmem:[%s2253_s3 + $0x9b0] sm:$0xff] }
  0xfb   : > { %1851 = vmatprep.subr.bf16.mxu1 %v1850_v56  ;;  %v1415_v56 = vld [vmem:[%s2253_s3 + $0x9c8] sm:$0xff]  ;;  %v1808_v60 = vpack.c.bf16 %v1412_v53, %v1410_v52 }
  0xfd   : > { %1789 = vmatpush1.bf16.msra.mxu0 %v1788_v62  ;;  %v1810_v62 = vpack.c.bf16 %v1417_v57, %v1415_v56 }
  0xfe   : > { %1853 = vmatpush1.bf16.msra.mxu1 %v1852_v63  ;;  %1791 = vmatprep.subr.bf16.mxu0 %v1790_v0  ;;  %v1414_v63 = vld [vmem:[%s2253_s3 + $0x9c0] sm:$0xff]  ;;  %v1416_v0 = vld [vmem:[%s2253_s3 + $0x9d0] sm:$0xff] }
  0xff   : > { %1855 = vmatprep.subr.bf16.mxu1 %v1854_v4  ;;  %v1419_v4 = vld [vmem:[%s2253_s3 + $0x9e8] sm:$0xff]  ;;  %v1812_v8 = vpack.c.bf16 %v1416_v0, %v1414_v63 }
 0x101   : > { %1793 = vmatpush1.bf16.msra.mxu0 %v1792_v10  ;;  %v1814_v10 = vpack.c.bf16 %v1421_v5, %v1419_v4 }
 0x102   : > { %1857 = vmatpush1.bf16.msra.mxu1 %v1856_v11  ;;  %1795 = vmatprep.subr.bf16.mxu0 %v1794_v12  ;;  %v1418_v11 = vld [vmem:[%s2253_s3 + $0x9e0] sm:$0xff]  ;;  %v1420_v12 = vld [vmem:[%s2253_s3 + $0x9f0] sm:$0xff] }
 0x103   : > { %1859 = vmatprep.subr.bf16.mxu1 %v1858_v17  ;;  %v1816_v17 = vpack.c.bf16 %v1420_v12, %v1418_v11 }
 0x105   : > { %1797 = vmatpush1.bf16.msra.mxu0 %v1796_v26 }
 0x106   : > { %1861 = vmatpush1.bf16.msra.mxu1 %v1860_v27  ;;  %1799 = vmatprep.subr.bf16.mxu0 %v1798_v28 }
 0x107   : > { %1863 = vmatprep.subr.bf16.mxu1 %v1862_v33 }
 0x109   : > { %1801 = vmatpush1.bf16.msra.mxu0 %v1800_v40 }
 0x10a   : > { %1865 = vmatpush1.bf16.msra.mxu1 %v1864_v41  ;;  %1803 = vmatprep.subr.bf16.mxu0 %v1802_v42 }
 0x10b   : > { %1867 = vmatprep.subr.bf16.mxu1 %v1866_v46 }
 0x10d   : > { %1805 = vmatpush1.bf16.msra.mxu0 %v1804_v51 }
 0x10e   : > { %1869 = vmatpush1.bf16.msra.mxu1 %v1868_v19  ;;  %1807 = vmatprep.subr.bf16.mxu0 %v1806_v20 }
 0x10f   : > { %1871 = vmatprep.subr.bf16.mxu1 %v1870_v54 }
 0x111   : > { %1809 = vmatpush1.bf16.msra.mxu0 %v1808_v60 }
 0x112   : > { %1873 = vmatpush1.bf16.msra.mxu1 %v1872_v61  ;;  %1811 = vmatprep.subr.bf16.mxu0 %v1810_v62 }
 0x113   : > { %1875 = vmatprep.subr.bf16.mxu1 %v1874_v2 }
 0x115   : > { %1813 = vmatpush1.bf16.msra.mxu0 %v1812_v8 }
 0x116   : > { %1877 = vmatpush1.bf16.msra.mxu1 %v1876_v9  ;;  %1815 = vmatprep.subr.bf16.mxu0 %v1814_v10 }
 0x117   : > { %1879 = vmatprep.subr.bf16.mxu1 %v1878_v13 }
 0x119   : > { %1817 = vmatpush1.bf16.msra.mxu0 %v1816_v17 }
 0x11a   : > { %1881 = vmatpush1.bf16.msra.mxu1 %v1880_v18 }
 0x11c   : > { %897 = vmatmul.mubr.f32.vlgmr.msra.gmra.mrb[4].mxu0 %v2546_v30 }
 0x11d   : > { %1043 = vmatmul.mubr.f32.vlgmr.msra.gmra.mrb[4].mxu1 %v2550_v35 }
 0x16f   : > { %v314_v21 = vpop.f32.mrb[0].mxu0 }
 0x170   : > { %v460_v23 = vpop.f32.mrb[0].mxu1  ;;  %v316_v24 = vpop.f32.mrb[1].mxu0 }
 0x171   : > { %v321_v25 = vcombine.low %v314_v21, %v316_v24  ;;  %v462_v26 = vpop.f32.mrb[1].mxu1 }
 0x172   : > { %v467_v27 = vcombine.low %v460_v23, %v462_v26 }
 0x173   : > { %323 = vst [vmem:[%s177_s17] sm:$0xff] %v321_v25 }
 0x174   : > { %1227 = vst [vmem:[%s177_s17 + $0x8] sm:$0xff] %v467_v27 }
 0x1af   : > { %v606_v28 = vpop.f32.mrb[2].mxu0 }
 0x1b0   : > { %v752_v29 = vpop.f32.mrb[2].mxu1  ;;  %v608_v31 = vpop.f32.mrb[3].mxu0 }
 0x1b1   : > { %v613_v32 = vcombine.low %v606_v28, %v608_v31  ;;  %v754_v33 = vpop.f32.mrb[3].mxu1 }
 0x1b2   : > { %v759_v30 = vcombine.low %v752_v29, %v754_v33 }
 0x1b3   : > { %1292 = vst [vmem:[%s177_s17 + $0x10] sm:$0xff] %v613_v32 }
 0x1b4   : > { %1357 = vst [vmem:[%s177_s17 + $0x18] sm:$0xff] %v759_v30 }
 0x1ef   : > { %v898_v35 = vpop.f32.mrb[4].mxu0 }
 0x1f0   : > { %v1044_v34 = vpop.f32.mrb[4].mxu1  ;;  %v900_v36 = vpop.f32.mrb[5].mxu0 }
 0x1f1   : > { %v905_v37 = vcombine.low %v898_v35, %v900_v36  ;;  %v1046_v38 = vpop.f32.mrb[5].mxu1 }
 0x1f2   : > { %v1051_v39 = vcombine.low %v1044_v34, %v1046_v38 }
 0x1f3   : > { %1422 = vst [vmem:[%s177_s17 + $0x20] sm:$0xff] %v905_v37 }
 0x1f4   : > { %1487 = vst [vmem:[%s177_s17 + $0x28] sm:$0xff] %v1051_v39 }
 0x1f5   : > { %2023 = shalt.err (!%p2020_p7)
}
 0x1f6   : > { %s2024_s24 = scalar_lea.hbm %s2680_s4, 768  ;;  %s2028_s26 = scalar_lea.hbm %s2726_s2, 1536 }
 0x1f7   : > { %p2025_p9 = scmp.ne.s32.totalorder %s2680_s4, %s2024_s24  ;;  %p2029_p5 = scmp.lt.u32.totalorder %s2680_s4, %s2726_s2 }
 0x1f8   : > { %p2030_p1 = scmp.lt.u32.totalorder %s2028_s26, %s2024_s24  ;;  %p2032_p4 = scmp.lt.u32.totalorder %s2024_s24, %s2680_s4 }
 0x1f9   : > { %p2026_p2 = pnand %p2025_p9, %p2197_p12 }
 0x1fa   : > { %p2031_p11 = por %p2030_p1, %p2029_p5 }
 0x1fb   : > { %p2027_p0 = pneg %p2026_p2 }
 0x1fc   : > { %p2033_p6 = por %p2032_p4, %p2031_p11 }
 0x1fe   : > { %p2034_p8 = pnand %p2033_p6, %p2027_p0 }
 0x200   : > { %2037 = shalt.err (!%p2034_p8)
}
 0x201   : > { %s2089_s3 = smov 128   ;;  %s2090_s15 = smov 8  }
 0x202   : > { %1891 = dma.vmem_to_hbm [thread:$0]  (%p2197_p12), %s2675_s27, 768, %s2680_s4, %s1056_s5, %s2089_s3, %s2089_s3, %s2090_s15  }
 0x203 PF: > { %s1085_s17 = sand.u32 1, %s2068_s9   ;;  %p2741_p10 = scmp.ne.s32.totalorder %s2731_s16, 0 }
 0x204   : > { %p2742_p13 = scmp.ge.s32.totalorder %s2080_s12, 2  ;;  %s1086_s19 = scalar_lea.sflag [#allocation4], %s1085_s17 }
 0x206   : > { %p1902_p3 = pnand %p2742_p13, %p2741_p10 }
 0x208   : > { %2063 = dma.done.wait (!%p1902_p3), %s1086_s19, 768  }
 0x209   : > { %2065 = vsyncadd (!%p1902_p3), %s1086_s19, 4294966528  ;;  %p16_p7 = scmp.ge.s32.totalorder %s2162_s21, 4   ;;  %s2743_s9 = smov %s2072_s10 }
 0x20a   : > { %s2744_s10 = smov %s2076_s11  ;;  %s2745_s11 = smov %s2193_s8 }
 0x20b   : > { %s2746_s12 = smov %s2162_s21  ;;  %18 = sbr.rel (!%p16_p7) target bundleno = 6 (0x6), region = 89 }
 0x212   :  { %1091 = vsyncpa [#allocation3], 1 }
 0x213   :  { %1093 = vsyncpa [#allocation3 + $0x1], 1 }
 0x214   :  { %1094 = vsyncpa [#allocation6], 1 }
 0x215   :  { %1096 = vsyncpa [#allocation6 + $0x1], 1 }
 0x216   :  { %1097 = vsyncpa [#allocation4], 1 }
 0x217   :  { %1099 = vsyncpa [#allocation4 + $0x1], 1 }

</bundles_post_ra>
